<compile_context>
chip_gen: v7x
topology: tpu7x:2x2x1
jax: 0.10.0
libtpu: 0.0.40
codegen_flags: <defaults>
</compile_context>

<pallas_src>
import functools

import jax
import jax.numpy as jnp
from jax.experimental import pallas as pl
from jax.experimental.pallas import tpu as pltpu

LANE = 128


def _round_up(x, m):
    return (x + m - 1) // m * m


def _conv_bn_prelu_kernel(x_ref, w_ref, shift_ref, alpha_ref, o_ref, *,
                          Kh, Kw, sh, sw, dh, dw, th, Wo):
    """Compute one (batch n, output-row tile hi) block.

    x_ref:     (1, 1, th_in, Wp, Cp)   haloed NHWC input row tile (Cp = Cin padded to 128)
    w_ref:     (Kh, Kw, Cp, Coutp)     conv weight with BN scale folded in (VMEM resident)
    shift_ref: (1, Coutp)              fused BN shift + conv bias
    alpha_ref: (1, Coutp)              PReLU slope (1.0 when bn_acti=False)
    o_ref:     (1, 1, th, Wo, Coutp)
    """
    Cp = x_ref.shape[-1]
    Coutp = o_ref.shape[-1]

    acc = jnp.zeros((th * Wo, Coutp), jnp.float32)
    # Static unroll over the Kh*Kw taps: input tile is read once from HBM; each
    # tap is a lane-aligned (th*Wo, Cp) x (Cp, Coutp) matmul accumulated in f32.
    for kh in range(Kh):
        rsl = pl.ds(kh * dh, th) if sh == 1 else pl.ds(kh * dh, th, sh)
        for kw in range(Kw):
            csl = pl.ds(kw * dw, Wo) if sw == 1 else pl.ds(kw * dw, Wo, sw)
            lhs = x_ref[0, 0, rsl, csl, :].reshape(th * Wo, Cp)
            acc = acc + jnp.dot(lhs, w_ref[kh, kw],
                                preferred_element_type=jnp.float32)

    # Epilogue: BN shift (+ folded bias) and PReLU.  Scale already folded into w.
    y = acc + shift_ref[...]
    y = jnp.where(y >= 0.0, y, alpha_ref[...] * y)
    o_ref[0, 0] = y.reshape(th, Wo, Coutp).astype(o_ref.dtype)


def conv_forward(x, weight, *, stride, padding, dilation=(1, 1), bias=None,
                 bn_acti=False, gamma=None, beta=None, running_mean=None,
                 running_var=None, prelu_alpha=None, eps=1e-3,
                 th=32, compute_dtype=jnp.float32):
    """Forward of `Conv` (groups=1).

    x:      (N, Cin, H, W)   float32  (NCHW, matching PyTorch)
    weight: (Kh, Kw, Cin, Cout)  == torch weight (Cout,Cin,Kh,Kw).transpose(2,3,1,0)
    th:     output rows per grid step (tile M = th*Wo); tune per generation.
    returns (N, Cout, Ho, Wo) float32
    """
    N, Cin, H, W = x.shape
    Kh, Kw, Cin_w, Cout = weight.shape
    assert Cin_w == Cin, "groups != 1 not supported"  # TODO(synk): grouped conv
    sh, sw = stride
    ph, pw = padding
    dh, dw = dilation
    Ho = (H + 2 * ph - dh * (Kh - 1) - 1) // sh + 1
    Wo = (W + 2 * pw - dw * (Kw - 1) - 1) // sw + 1

    Cp = _round_up(Cin, LANE)
    Coutp = _round_up(Cout, LANE)

    # ---- fold conv bias + BN(eval) + PReLU into per-channel scale/shift/alpha ----
    if bn_acti:
        inv_std = 1.0 / jnp.sqrt(running_var + eps)
        scale = gamma * inv_std
        shift = beta - running_mean * scale
        alpha = prelu_alpha
    else:
        scale = jnp.ones((Cout,), jnp.float32)
        shift = jnp.zeros((Cout,), jnp.float32)
        alpha = jnp.ones((Cout,), jnp.float32)   # alpha=1 => identity on negatives
    if bias is not None:
        shift = shift + scale * bias

    # Fold BN scale into the weights and pad channels to lane width.
    wf = weight.astype(jnp.float32) * scale[None, None, None, :]
    wf = jnp.pad(wf, ((0, 0), (0, 0), (0, Cp - Cin), (0, Coutp - Cout)))
    wf = wf.astype(compute_dtype)
    shift_p = jnp.pad(shift, (0, Coutp - Cout)).reshape(1, Coutp).astype(jnp.float32)
    alpha_p = jnp.pad(alpha, (0, Coutp - Cout)).reshape(1, Coutp).astype(jnp.float32)

    # ---- output-row tiling with replicated halo rows (glue only; ~1.06x copy) ----
    th = max(1, min(th, Ho))
    n_ht = pl.cdiv(Ho, th)
    Ho_pad = n_ht * th
    th_in = (th - 1) * sh + (Kh - 1) * dh + 1
    H_need = (Ho_pad - 1) * sh + (Kh - 1) * dh + 1
    Wp = W + 2 * pw

    xn = jnp.transpose(x, (0, 2, 3, 1))                                # NHWC
    pad_bottom = max(ph, H_need - H - ph)
    xp = jnp.pad(xn, ((0, 0), (ph, pad_bottom), (pw, pw), (0, Cp - Cin)))
    xp = xp.astype(compute_dtype)
    # (N, n_ht, th_in, Wp, Cp): each row tile carries its (Kh-1)*dh halo rows.
    xt = jnp.stack(
        [xp[:, i * th * sh: i * th * sh + th_in] for i in range(n_ht)], axis=1)

    kernel = functools.partial(_conv_bn_prelu_kernel, Kh=Kh, Kw=Kw,
                               sh=sh, sw=sw, dh=dh, dw=dw, th=th, Wo=Wo)

    # VMEM budget: double-buffered in/out tiles + resident weight + params.
    bpe = jnp.dtype(compute_dtype).itemsize
    vmem_need = (2 * th_in * Wp * Cp * bpe
                 + 2 * th * Wo * Coutp * 4
                 + 2 * Kh * Kw * Cp * Coutp * bpe
                 + 4 * Coutp * 4)
    vmem_limit = int(min(max(32 * 1024 * 1024, 2 * vmem_need),
                         60 * 1024 * 1024))          # headroom below v7x 64 MiB

    cost = pl.CostEstimate(
        flops=2 * N * Ho * Wo * Kh * Kw * Cin * Cout,
        transcendentals=0,
        bytes_accessed=(x.size * x.dtype.itemsize
                        + weight.size * weight.dtype.itemsize
                        + N * Ho * Wo * Cout * 4))

    out = pl.pallas_call(
        kernel,
        out_shape=jax.ShapeDtypeStruct((N, n_ht, th, Wo, Coutp), jnp.float32),
        grid=(N, n_ht),
        in_specs=[
            pl.BlockSpec((1, 1, th_in, Wp, Cp), lambda n, hi: (n, hi, 0, 0, 0)),
            pl.BlockSpec((Kh, Kw, Cp, Coutp), lambda n, hi: (0, 0, 0, 0)),
            pl.BlockSpec((1, Coutp), lambda n, hi: (0, 0)),
            pl.BlockSpec((1, Coutp), lambda n, hi: (0, 0)),
        ],
        out_specs=pl.BlockSpec((1, 1, th, Wo, Coutp),
                               lambda n, hi: (n, hi, 0, 0, 0)),
        compiler_params=pltpu.CompilerParams(
            dimension_semantics=("parallel", "parallel"),
            vmem_limit_bytes=vmem_limit),
        cost_estimate=cost,
    )(xt, wf, shift_p, alpha_p)

    out = out.reshape(N, Ho_pad, Wo, Coutp)[:, :Ho, :, :Cout]
    return jnp.transpose(out, (0, 3, 1, 2))                            # back to NCHW


def _reference(x, weight, *, stride, padding, dilation, bn_acti,
               gamma, beta, running_mean, running_var, prelu_alpha, eps=1e-3):
    """Pure-JAX reference (lax conv + eval BN + PReLU) for validation."""
    w_oihw = jnp.transpose(weight, (3, 2, 0, 1))
    y = jax.lax.conv_general_dilated(
        x, w_oihw, window_strides=stride,
        padding=[(padding[0], padding[0]), (padding[1], padding[1])],
        rhs_dilation=dilation,
        dimension_numbers=("NCHW", "OIHW", "NCHW"))
    if bn_acti:
        inv = 1.0 / jnp.sqrt(running_var + eps)
        s = (gamma * inv)[None, :, None, None]
        y = (y - running_mean[None, :, None, None]) * s + beta[None, :, None, None]
        a = prelu_alpha[None, :, None, None]
        y = jnp.where(y >= 0.0, y, a * y)
    return y


if __name__ == "__main__":
    # Conv(nIn=4, nOut=8, kSize=3, stride=1, padding=1, bn_acti=True, bias=False)
    N, Cin, H, W = 2, 4, 16, 16
    Cout, K = 8, 3
    stride, padding, dilation = (1, 1), (1, 1), (1, 1)

    key = jax.random.PRNGKey(0)
    kx, kw, kg, kb, km, kv, ka = jax.random.split(key, 7)

    x = jax.random.normal(kx, (N, Cin, H, W), jnp.float32)
    weight = jax.random.normal(kw, (K, K, Cin, Cout), jnp.float32) * 0.1
    gamma = 1.0 + 0.1 * jax.random.normal(kg, (Cout,), jnp.float32)
    beta = 0.1 * jax.random.normal(kb, (Cout,), jnp.float32)
    running_mean = 0.1 * jax.random.normal(km, (Cout,), jnp.float32)
    running_var = jnp.abs(1.0 + 0.1 * jax.random.normal(kv, (Cout,), jnp.float32))
    prelu_alpha = jnp.full((Cout,), 0.25, jnp.float32)   # PyTorch PReLU default init

    out = conv_forward(
        x, weight, stride=stride, padding=padding, dilation=dilation,
        bias=None, bn_acti=True, gamma=gamma, beta=beta,
        running_mean=running_mean, running_var=running_var,
        prelu_alpha=prelu_alpha)
    out = jax.block_until_ready(out)

    ref = _reference(
        x, weight, stride=stride, padding=padding, dilation=dilation,
        bn_acti=True, gamma=gamma, beta=beta, running_mean=running_mean,
        running_var=running_var, prelu_alpha=prelu_alpha)

    assert out.shape == (N, Cout, H, W), out.shape
    err = float(jnp.max(jnp.abs(out - ref)))
    assert jnp.allclose(out, ref, atol=2e-4, rtol=2e-4), err
    print("KERNEL_OK")
</pallas_src>

<mosaic_0001>
module attributes {stable_mosaic.version = 11 : i64} {
  func.func @_conv_bn_prelu_kernel(%arg0: i32, %arg1: i32, %arg2: memref<1x1x18x18x128xf32, #tpu.memory_space<vmem>>, %arg3: memref<3x3x128x128xf32, #tpu.memory_space<vmem>>, %arg4: memref<1x128xf32, #tpu.memory_space<vmem>>, %arg5: memref<1x128xf32, #tpu.memory_space<vmem>>, %arg6: memref<1x1x16x16x128xf32, #tpu.memory_space<vmem>>) attributes {dimension_semantics = [#tpu.dimension_semantics<parallel>, #tpu.dimension_semantics<parallel>], iteration_bounds = array<i64: 2, 1>, scalar_prefetch = 0 : i64, scratch_operands = 0 : i64, tpu.core_type = #tpu.core_type<tc>, window_params = [{transform_indices = @transform_0, window_bounds = array<i64: 1, 1, 18, 18, 128>}, {pipeline_mode = #tpu.pipeline_mode<synchronous>, transform_indices = @transform_1, window_bounds = array<i64: 3, 3, 128, 128>}, {pipeline_mode = #tpu.pipeline_mode<synchronous>, transform_indices = @transform_2, window_bounds = array<i64: 1, 128>}, {pipeline_mode = #tpu.pipeline_mode<synchronous>, transform_indices = @transform_3, window_bounds = array<i64: 1, 128>}, {transform_indices = @transform_4, window_bounds = array<i64: 1, 1, 16, 16, 128>}]} {
    %cst = arith.constant 0.000000e+00 : f32
    %0 = vector.broadcast %cst : f32 to vector<256x128xf32>
    %c0 = arith.constant 0 : index
    %c0_0 = arith.constant 0 : index
    %c0_1 = arith.constant 0 : index
    %c0_2 = arith.constant 0 : index
    %c0_3 = arith.constant 0 : index
    %1 = vector.load %arg2[%c0, %c0_0, %c0_1, %c0_2, %c0_3] : memref<1x1x18x18x128xf32, #tpu.memory_space<vmem>>, vector<1x1x16x16x128xf32>
    %2 = vector.shape_cast %1 : vector<1x1x16x16x128xf32> to vector<16x16x128xf32>
    %3 = vector.shape_cast %2 : vector<16x16x128xf32> to vector<256x128xf32>
    %c0_4 = arith.constant 0 : index
    %c0_5 = arith.constant 0 : index
    %c0_6 = arith.constant 0 : index
    %c0_7 = arith.constant 0 : index
    %4 = vector.load %arg3[%c0_4, %c0_5, %c0_6, %c0_7] : memref<3x3x128x128xf32, #tpu.memory_space<vmem>>, vector<1x1x128x128xf32>
    %5 = vector.shape_cast %4 : vector<1x1x128x128xf32> to vector<128x128xf32>
    %cst_8 = arith.constant dense<0.000000e+00> : vector<256x128xf32>
    %6 = tpu.matmul %3, %5, %cst_8 {dimension_numbers = #tpu.dot_dimension_numbers<[1], [0], [0], [1], [0, 0, 1, 1], [], []>} : vector<256x128xf32>, vector<128x128xf32>, vector<256x128xf32> -> vector<256x128xf32>
    %7 = arith.addf %0, %6 : vector<256x128xf32>
    %c0_9 = arith.constant 0 : index
    %c0_10 = arith.constant 0 : index
    %c0_11 = arith.constant 0 : index
    %c1 = arith.constant 1 : index
    %c0_12 = arith.constant 0 : index
    %8 = vector.load %arg2[%c0_9, %c0_10, %c0_11, %c1, %c0_12] : memref<1x1x18x18x128xf32, #tpu.memory_space<vmem>>, vector<1x1x16x16x128xf32>
    %9 = vector.shape_cast %8 : vector<1x1x16x16x128xf32> to vector<16x16x128xf32>
    %10 = vector.shape_cast %9 : vector<16x16x128xf32> to vector<256x128xf32>
    %c0_13 = arith.constant 0 : index
    %c1_14 = arith.constant 1 : index
    %c0_15 = arith.constant 0 : index
    %c0_16 = arith.constant 0 : index
    %11 = vector.load %arg3[%c0_13, %c1_14, %c0_15, %c0_16] : memref<3x3x128x128xf32, #tpu.memory_space<vmem>>, vector<1x1x128x128xf32>
    %12 = vector.shape_cast %11 : vector<1x1x128x128xf32> to vector<128x128xf32>
    %cst_17 = arith.constant dense<0.000000e+00> : vector<256x128xf32>
    %13 = tpu.matmul %10, %12, %cst_17 {dimension_numbers = #tpu.dot_dimension_numbers<[1], [0], [0], [1], [0, 0, 1, 1], [], []>} : vector<256x128xf32>, vector<128x128xf32>, vector<256x128xf32> -> vector<256x128xf32>
    %14 = arith.addf %7, %13 : vector<256x128xf32>
    %c0_18 = arith.constant 0 : index
    %c0_19 = arith.constant 0 : index
    %c0_20 = arith.constant 0 : index
    %c2 = arith.constant 2 : index
    %c0_21 = arith.constant 0 : index
    %15 = vector.load %arg2[%c0_18, %c0_19, %c0_20, %c2, %c0_21] : memref<1x1x18x18x128xf32, #tpu.memory_space<vmem>>, vector<1x1x16x16x128xf32>
    %16 = vector.shape_cast %15 : vector<1x1x16x16x128xf32> to vector<16x16x128xf32>
    %17 = vector.shape_cast %16 : vector<16x16x128xf32> to vector<256x128xf32>
    %c0_22 = arith.constant 0 : index
    %c2_23 = arith.constant 2 : index
    %c0_24 = arith.constant 0 : index
    %c0_25 = arith.constant 0 : index
    %18 = vector.load %arg3[%c0_22, %c2_23, %c0_24, %c0_25] : memref<3x3x128x128xf32, #tpu.memory_space<vmem>>, vector<1x1x128x128xf32>
    %19 = vector.shape_cast %18 : vector<1x1x128x128xf32> to vector<128x128xf32>
    %cst_26 = arith.constant dense<0.000000e+00> : vector<256x128xf32>
    %20 = tpu.matmul %17, %19, %cst_26 {dimension_numbers = #tpu.dot_dimension_numbers<[1], [0], [0], [1], [0, 0, 1, 1], [], []>} : vector<256x128xf32>, vector<128x128xf32>, vector<256x128xf32> -> vector<256x128xf32>
    %21 = arith.addf %14, %20 : vector<256x128xf32>
    %c0_27 = arith.constant 0 : index
    %c0_28 = arith.constant 0 : index
    %c1_29 = arith.constant 1 : index
    %c0_30 = arith.constant 0 : index
    %c0_31 = arith.constant 0 : index
    %22 = vector.load %arg2[%c0_27, %c0_28, %c1_29, %c0_30, %c0_31] : memref<1x1x18x18x128xf32, #tpu.memory_space<vmem>>, vector<1x1x16x16x128xf32>
    %23 = vector.shape_cast %22 : vector<1x1x16x16x128xf32> to vector<16x16x128xf32>
    %24 = vector.shape_cast %23 : vector<16x16x128xf32> to vector<256x128xf32>
    %c1_32 = arith.constant 1 : index
    %c0_33 = arith.constant 0 : index
    %c0_34 = arith.constant 0 : index
    %c0_35 = arith.constant 0 : index
    %25 = vector.load %arg3[%c1_32, %c0_33, %c0_34, %c0_35] : memref<3x3x128x128xf32, #tpu.memory_space<vmem>>, vector<1x1x128x128xf32>
    %26 = vector.shape_cast %25 : vector<1x1x128x128xf32> to vector<128x128xf32>
    %cst_36 = arith.constant dense<0.000000e+00> : vector<256x128xf32>
    %27 = tpu.matmul %24, %26, %cst_36 {dimension_numbers = #tpu.dot_dimension_numbers<[1], [0], [0], [1], [0, 0, 1, 1], [], []>} : vector<256x128xf32>, vector<128x128xf32>, vector<256x128xf32> -> vector<256x128xf32>
    %28 = arith.addf %21, %27 : vector<256x128xf32>
    %c0_37 = arith.constant 0 : index
    %c0_38 = arith.constant 0 : index
    %c1_39 = arith.constant 1 : index
    %c1_40 = arith.constant 1 : index
    %c0_41 = arith.constant 0 : index
    %29 = vector.load %arg2[%c0_37, %c0_38, %c1_39, %c1_40, %c0_41] : memref<1x1x18x18x128xf32, #tpu.memory_space<vmem>>, vector<1x1x16x16x128xf32>
    %30 = vector.shape_cast %29 : vector<1x1x16x16x128xf32> to vector<16x16x128xf32>
    %31 = vector.shape_cast %30 : vector<16x16x128xf32> to vector<256x128xf32>
    %c1_42 = arith.constant 1 : index
    %c1_43 = arith.constant 1 : index
    %c0_44 = arith.constant 0 : index
    %c0_45 = arith.constant 0 : index
    %32 = vector.load %arg3[%c1_42, %c1_43, %c0_44, %c0_45] : memref<3x3x128x128xf32, #tpu.memory_space<vmem>>, vector<1x1x128x128xf32>
    %33 = vector.shape_cast %32 : vector<1x1x128x128xf32> to vector<128x128xf32>
    %cst_46 = arith.constant dense<0.000000e+00> : vector<256x128xf32>
    %34 = tpu.matmul %31, %33, %cst_46 {dimension_numbers = #tpu.dot_dimension_numbers<[1], [0], [0], [1], [0, 0, 1, 1], [], []>} : vector<256x128xf32>, vector<128x128xf32>, vector<256x128xf32> -> vector<256x128xf32>
    %35 = arith.addf %28, %34 : vector<256x128xf32>
    %c0_47 = arith.constant 0 : index
    %c0_48 = arith.constant 0 : index
    %c1_49 = arith.constant 1 : index
    %c2_50 = arith.constant 2 : index
    %c0_51 = arith.constant 0 : index
    %36 = vector.load %arg2[%c0_47, %c0_48, %c1_49, %c2_50, %c0_51] : memref<1x1x18x18x128xf32, #tpu.memory_space<vmem>>, vector<1x1x16x16x128xf32>
    %37 = vector.shape_cast %36 : vector<1x1x16x16x128xf32> to vector<16x16x128xf32>
    %38 = vector.shape_cast %37 : vector<16x16x128xf32> to vector<256x128xf32>
    %c1_52 = arith.constant 1 : index
    %c2_53 = arith.constant 2 : index
    %c0_54 = arith.constant 0 : index
    %c0_55 = arith.constant 0 : index
    %39 = vector.load %arg3[%c1_52, %c2_53, %c0_54, %c0_55] : memref<3x3x128x128xf32, #tpu.memory_space<vmem>>, vector<1x1x128x128xf32>
    %40 = vector.shape_cast %39 : vector<1x1x128x128xf32> to vector<128x128xf32>
    %cst_56 = arith.constant dense<0.000000e+00> : vector<256x128xf32>
    %41 = tpu.matmul %38, %40, %cst_56 {dimension_numbers = #tpu.dot_dimension_numbers<[1], [0], [0], [1], [0, 0, 1, 1], [], []>} : vector<256x128xf32>, vector<128x128xf32>, vector<256x128xf32> -> vector<256x128xf32>
    %42 = arith.addf %35, %41 : vector<256x128xf32>
    %c0_57 = arith.constant 0 : index
    %c0_58 = arith.constant 0 : index
    %c2_59 = arith.constant 2 : index
    %c0_60 = arith.constant 0 : index
    %c0_61 = arith.constant 0 : index
    %43 = vector.load %arg2[%c0_57, %c0_58, %c2_59, %c0_60, %c0_61] : memref<1x1x18x18x128xf32, #tpu.memory_space<vmem>>, vector<1x1x16x16x128xf32>
    %44 = vector.shape_cast %43 : vector<1x1x16x16x128xf32> to vector<16x16x128xf32>
    %45 = vector.shape_cast %44 : vector<16x16x128xf32> to vector<256x128xf32>
    %c2_62 = arith.constant 2 : index
    %c0_63 = arith.constant 0 : index
    %c0_64 = arith.constant 0 : index
    %c0_65 = arith.constant 0 : index
    %46 = vector.load %arg3[%c2_62, %c0_63, %c0_64, %c0_65] : memref<3x3x128x128xf32, #tpu.memory_space<vmem>>, vector<1x1x128x128xf32>
    %47 = vector.shape_cast %46 : vector<1x1x128x128xf32> to vector<128x128xf32>
    %cst_66 = arith.constant dense<0.000000e+00> : vector<256x128xf32>
    %48 = tpu.matmul %45, %47, %cst_66 {dimension_numbers = #tpu.dot_dimension_numbers<[1], [0], [0], [1], [0, 0, 1, 1], [], []>} : vector<256x128xf32>, vector<128x128xf32>, vector<256x128xf32> -> vector<256x128xf32>
    %49 = arith.addf %42, %48 : vector<256x128xf32>
    %c0_67 = arith.constant 0 : index
    %c0_68 = arith.constant 0 : index
    %c2_69 = arith.constant 2 : index
    %c1_70 = arith.constant 1 : index
    %c0_71 = arith.constant 0 : index
    %50 = vector.load %arg2[%c0_67, %c0_68, %c2_69, %c1_70, %c0_71] : memref<1x1x18x18x128xf32, #tpu.memory_space<vmem>>, vector<1x1x16x16x128xf32>
    %51 = vector.shape_cast %50 : vector<1x1x16x16x128xf32> to vector<16x16x128xf32>
    %52 = vector.shape_cast %51 : vector<16x16x128xf32> to vector<256x128xf32>
    %c2_72 = arith.constant 2 : index
    %c1_73 = arith.constant 1 : index
    %c0_74 = arith.constant 0 : index
    %c0_75 = arith.constant 0 : index
    %53 = vector.load %arg3[%c2_72, %c1_73, %c0_74, %c0_75] : memref<3x3x128x128xf32, #tpu.memory_space<vmem>>, vector<1x1x128x128xf32>
    %54 = vector.shape_cast %53 : vector<1x1x128x128xf32> to vector<128x128xf32>
    %cst_76 = arith.constant dense<0.000000e+00> : vector<256x128xf32>
    %55 = tpu.matmul %52, %54, %cst_76 {dimension_numbers = #tpu.dot_dimension_numbers<[1], [0], [0], [1], [0, 0, 1, 1], [], []>} : vector<256x128xf32>, vector<128x128xf32>, vector<256x128xf32> -> vector<256x128xf32>
    %56 = arith.addf %49, %55 : vector<256x128xf32>
    %c0_77 = arith.constant 0 : index
    %c0_78 = arith.constant 0 : index
    %c2_79 = arith.constant 2 : index
    %c2_80 = arith.constant 2 : index
    %c0_81 = arith.constant 0 : index
    %57 = vector.load %arg2[%c0_77, %c0_78, %c2_79, %c2_80, %c0_81] : memref<1x1x18x18x128xf32, #tpu.memory_space<vmem>>, vector<1x1x16x16x128xf32>
    %58 = vector.shape_cast %57 : vector<1x1x16x16x128xf32> to vector<16x16x128xf32>
    %59 = vector.shape_cast %58 : vector<16x16x128xf32> to vector<256x128xf32>
    %c2_82 = arith.constant 2 : index
    %c2_83 = arith.constant 2 : index
    %c0_84 = arith.constant 0 : index
    %c0_85 = arith.constant 0 : index
    %60 = vector.load %arg3[%c2_82, %c2_83, %c0_84, %c0_85] : memref<3x3x128x128xf32, #tpu.memory_space<vmem>>, vector<1x1x128x128xf32>
    %61 = vector.shape_cast %60 : vector<1x1x128x128xf32> to vector<128x128xf32>
    %cst_86 = arith.constant dense<0.000000e+00> : vector<256x128xf32>
    %62 = tpu.matmul %59, %61, %cst_86 {dimension_numbers = #tpu.dot_dimension_numbers<[1], [0], [0], [1], [0, 0, 1, 1], [], []>} : vector<256x128xf32>, vector<128x128xf32>, vector<256x128xf32> -> vector<256x128xf32>
    %63 = arith.addf %56, %62 : vector<256x128xf32>
    %c0_87 = arith.constant 0 : index
    %c0_88 = arith.constant 0 : index
    %64 = vector.load %arg4[%c0_87, %c0_88] : memref<1x128xf32, #tpu.memory_space<vmem>>, vector<1x128xf32>
    %65 = vector.broadcast %64 : vector<1x128xf32> to vector<256x128xf32>
    %66 = arith.addf %63, %65 : vector<256x128xf32>
    %cst_89 = arith.constant 0.000000e+00 : f32
    %67 = vector.broadcast %cst_89 : f32 to vector<256x128xf32>
    %68 = arith.cmpf oge, %66, %67 : vector<256x128xf32>
    %c0_90 = arith.constant 0 : index
    %c0_91 = arith.constant 0 : index
    %69 = vector.load %arg5[%c0_90, %c0_91] : memref<1x128xf32, #tpu.memory_space<vmem>>, vector<1x128xf32>
    %70 = vector.broadcast %69 : vector<1x128xf32> to vector<256x128xf32>
    %71 = arith.mulf %70, %66 : vector<256x128xf32>
    %72 = arith.select %68, %66, %71 : vector<256x128xi1>, vector<256x128xf32>
    %73 = vector.shape_cast %72 : vector<256x128xf32> to vector<16x16x128xf32>
    %c0_92 = arith.constant 0 : index
    %c0_93 = arith.constant 0 : index
    %c0_94 = arith.constant 0 : index
    %c0_95 = arith.constant 0 : index
    %c0_96 = arith.constant 0 : index
    %74 = vector.load %arg6[%c0_92, %c0_93, %c0_94, %c0_95, %c0_96] : memref<1x1x16x16x128xf32, #tpu.memory_space<vmem>>, vector<1x1x16x16x128xf32>
    %75 = vector.shape_cast %74 : vector<1x1x16x16x128xf32> to vector<16x16x128xf32>
    %76 = vector.shape_cast %73 : vector<16x16x128xf32> to vector<1x1x16x16x128xf32>
    tpu.vector_store %arg6[%c0_92, %c0_93, %c0_94, %c0_95, %c0_96], %76 {strides = array<i32>} : memref<1x1x16x16x128xf32, #tpu.memory_space<vmem>>, vector<1x1x16x16x128xf32>,
    return
  }
  func.func @transform_0(%arg0: i32, %arg1: i32) -> (i32, i32, i32, i32, i32) {
    %c0_i32 = arith.constant 0 : i32
    %c0_i32_0 = arith.constant 0 : i32
    %c0_i32_1 = arith.constant 0 : i32
    %c0_i32_2 = arith.constant 0 : i32
    return %arg0, %arg1, %c0_i32, %c0_i32_0, %c0_i32_1 : i32, i32, i32, i32, i32
  }
  func.func @transform_1(%arg0: i32, %arg1: i32) -> (i32, i32, i32, i32) {
    %c0_i32 = arith.constant 0 : i32
    %c0_i32_0 = arith.constant 0 : i32
    %c0_i32_1 = arith.constant 0 : i32
    %c0_i32_2 = arith.constant 0 : i32
    %c0_i32_3 = arith.constant 0 : i32
    return %c0_i32, %c0_i32_0, %c0_i32_1, %c0_i32_2 : i32, i32, i32, i32
  }
  func.func @transform_2(%arg0: i32, %arg1: i32) -> (i32, i32) {
    %c0_i32 = arith.constant 0 : i32
    %c0_i32_0 = arith.constant 0 : i32
    %c0_i32_1 = arith.constant 0 : i32
    return %c0_i32, %c0_i32_0 : i32, i32
  }
  func.func @transform_3(%arg0: i32, %arg1: i32) -> (i32, i32) {
    %c0_i32 = arith.constant 0 : i32
    %c0_i32_0 = arith.constant 0 : i32
    %c0_i32_1 = arith.constant 0 : i32
    return %c0_i32, %c0_i32_0 : i32, i32
  }
  func.func @transform_4(%arg0: i32, %arg1: i32) -> (i32, i32, i32, i32, i32) {
    %c0_i32 = arith.constant 0 : i32
    %c0_i32_0 = arith.constant 0 : i32
    %c0_i32_1 = arith.constant 0 : i32
    %c0_i32_2 = arith.constant 0 : i32
    return %arg0, %arg1, %c0_i32, %c0_i32_0, %c0_i32_1 : i32, i32, i32, i32, i32
  }
}

</mosaic_0001>

<bundles_post_ra>
// kernel: tpu_custom_call.1
= control target key start
LH: loop header
LB: loop body
LE: loop exit
PB: predicated region body
PF: predicated region fallthrough
CT: control target
= control target key end

     0   :  { %9 = vsyncpa [#allocation3], 0  ;;  %s6672_s0 = inlined_call_operand.vmem [shape: f32[2,1,18,18,128], index: 0, kind: input, shape index: {}]   ;;  %s6673_s1 = inlined_call_operand.vmem [shape: f32[3,3,128,128], index: 1, kind: input, shape index: {}]   ;;  %s6674_s2 = inlined_call_operand.vmem [shape: f32[1,128], index: 2, kind: input, shape index: {}]   ;;  %s6675_s3 = inlined_call_operand.vmem [shape: f32[1,128], index: 3, kind: input, shape index: {}]   ;;  %s6676_s4 = inlined_call_operand.hbm [shape: f32[2,1,16,16,128], index: 4, kind: output, shape index: {}]  }
   0x1   :  { %11 = vsyncpa [#allocation3 + $0x1], 0  ;;  %s5400_s15 = smov 0   ;;  %s5402_s16 = smov 0  }
   0x2   :  { %s5404_s17 = smov 0   ;;  %s5406_s18 = smov 0  }
   0x3   :  { %s5408_s19 = smov 0   ;;  %s5410_s20 = smov 0  }
   0x4 LB: > { %s3187_s21 = sadd.s32 4294967295, %s5370_s20   ;;  %s3188_s22 = sadd.s32 4294967294, %s5370_s20   ;;  %s5370_s20 = sphi %s5410_s20, %s17_s20   ;;  %s5366_s19 = sphi %s5408_s19, %s6783_s19   ;;  %s5362_s18 = sphi %s5406_s18, %s6782_s18   ;;  %s5358_s17 = sphi %s5404_s17, %s6781_s17   ;;  %s5354_s16 = sphi %s5402_s16, %s6780_s16   ;;  %s5350_s15 = sphi %s5400_s15, %s6779_s15  }
   0x5   : > { %s29_s23 = sadd.s32 1, %s5366_s19  ;;  %s129_s24 = sadd.s32 1, %s5358_s17 }
   0x6   : > { %p31_p0 = scmp.ge.s32.totalorder %s29_s23, 2  ;;  %p139_p1 = scmp.ne.s32.totalorder %s5358_s17, %s5354_s16 }
   0x7   : > { %p140_p2 = scmp.eq.s32.totalorder %s3187_s21, 1  ;;  %p145_p3 = scmp.ne.s32.totalorder %s5354_s16, %s5350_s15 }
   0x8   : > { %s6785_s23 = smov (%p31_p0, %s29_s23), 0  ;;  %p146_p5 = scmp.eq.s32.totalorder %s3188_s22, 1 }
   0x9   : > { %p5440_p4 = por %p140_p2, %p139_p1  ;;  %s124_s26 = ssub.s32 %s5366_s19, %s6785_s23 }
   0xa   : > { %p3191_p6 = scmp.ge.s32.totalorder %s5370_s20, 1  ;;  %p127_p7 = scmp.eq.s32.totalorder %s124_s26, 0 }
   0xb   : > { %p5447_p8 = por %p146_p5, %p145_p3  ;;  %p185_p9 = scmp.lt.s32.totalorder %s5370_s20, 3 }
   0xc   : > { %s5453_s28 = scalar_select %p127_p7, %s5358_s17, %s129_s24  }
   0xd   : > { %p186_p10 = pnand %p3191_p6, %p185_p9 }
   0xf   : > { %189 = sbr.rel (%p186_p10) target bundleno = 577 (0x241), region = 36 }
  0x16   : > { %v3194_v0 = vld [vmem:[%s6673_s1 + $0x80] sm:$0xff]  ;;  %v3195_v1 = vld [vmem:[%s6673_s1 + $0x88] sm:$0xff]  ;;  %p215_p11 = scmp.lt.s32.totalorder %s5362_s18, 1  ;;  %v3196_v5 = vld [vmem:[%s6673_s1 + $0x90] sm:$0xff]  ;;  %s3521_s21 = sshll.u32 %s5362_s18, 12 }
  0x17   : > { %v3306_v2 = vld [vmem:[%s6673_s1 + $0x200] sm:$0xff]  ;;  %v4674_v3 = vpack.c.bf16 %v3195_v1, %v3194_v0  ;;  %v3307_v4 = vld [vmem:[%s6673_s1 + $0x208] sm:$0xff]  ;;  %v3197_v6 = vld [vmem:[%s6673_s1 + $0x98] sm:$0xff]  ;;  %s6618_s29 = scalar_lea.hbm %s6676_s4, %s3521_s21 }
  0x18   : > { %v5474_v7 = vpack.c.bf16 %v3307_v4, %v3306_v2  ;;  %v4678_v8 = vpack.c.bf16 %v3197_v6, %v3196_v5  ;;  %v3308_v9 = vld [vmem:[%s6673_s1 + $0x210] sm:$0xff]  ;;  %v3309_v10 = vld [vmem:[%s6673_s1 + $0x218] sm:$0xff]  ;;  %v3198_v11 = vld [vmem:[%s6673_s1 + $0xa0] sm:$0xff]  ;;  %s216_s5 = scalar_select %p215_p11, %s5362_s18, 1 }
  0x19   : > { %4675 = vmatprep.subr.bf16.mxu1 %v4674_v3  ;;  %v5486_v12 = vpack.c.bf16 %v3309_v10, %v3308_v9  ;;  %v3199_v13 = vld [vmem:[%s6673_s1 + $0xa8] sm:$0xff]  ;;  %v3310_v14 = vld [vmem:[%s6673_s1 + $0x220] sm:$0xff]  ;;  %v3200_v18 = vld [vmem:[%s6673_s1 + $0xb0] sm:$0xff] }
  0x1a   : > { %v3311_v15 = vld [vmem:[%s6673_s1 + $0x228] sm:$0xff]  ;;  %4803 = vmatprep.subr.bf16.mxu0 %v5474_v7  ;;  %4677 = vmatpush3.bf16.msra.mxu1 %v4674_v3  ;;  %s5234_s12 = smul.u32 432, %s216_s5  ;;  %v4682_v16 = vpack.c.bf16 %v3199_v13, %v3198_v11  ;;  %v3201_v19 = vld [vmem:[%s6673_s1 + $0xb8] sm:$0xff]  ;;  %v3312_v20 = vld [vmem:[%s6673_s1 + $0x230] sm:$0xff]  ;;  %s5372_s5 = smov [#allocation2]  }
  0x1b   : > { %6717 = vst [vmem:[#allocation5_spill] sm:$0xff] %v5486_v12  ;;  %4805 = vmatpush3.bf16.msra.mxu0 %v5474_v7  ;;  %4679 = vmatprep.subr.bf16.mxu1 %v4678_v8  ;;  %v5500_v17 = vpack.c.bf16 %v3311_v15, %v3310_v14  ;;  %v3313_v21 = vld [vmem:[%s6673_s1 + $0x238] sm:$0xff]  ;;  %v4686_v22 = vpack.c.bf16 %v3201_v19, %v3200_v18  ;;  %v3202_v24 = vld [vmem:[%s6673_s1 + $0xc0] sm:$0xff]  ;;  %v3203_v25 = vld [vmem:[%s6673_s1 + $0xc8] sm:$0xff]  ;;  %s5296_s6 = sshll.u32 %s5372_s5, 4  ;;  %s5297_s6 = int_to_ptr.vmem [resolvable:$false] %s5296_s6 }
  0x1c   : > { %4807 = vmatprep.subr.bf16.mxu0 %v5486_v12  ;;  %s5517_s7 = scalar_lea.vmem %s6672_s0, %s5234_s12  ;;  %v5521_v23 = vpack.c.bf16 %v3313_v21, %v3312_v20  ;;  %v3314_v27 = vld [vmem:[%s6673_s1 + $0x240] sm:$0xff]  ;;  %v3315_v28 = vld [vmem:[%s6673_s1 + $0x248] sm:$0xff]  ;;  %v4690_v30 = vpack.c.bf16 %v3203_v25, %v3202_v24  ;;  %v3204_v32 = vld [vmem:[%s6673_s1 + $0xd0] sm:$0xff]  ;;  %s5298_s8 = scalar_lea.vmem %s5297_s6, 8192 }
  0x1d   : > { %6718 = vst [vmem:[#allocation6_spill] sm:$0xff] %v5500_v17  ;;  %v272_v26 = vld [vmem:[%s5517_s7 + $0x1] sm:$0xff]  ;;  %v5537_v29 = vld [vmem:[%s5517_s7 + $0x19] sm:$0xff]  ;;  %v5542_v31 = vpack.c.bf16 %v3315_v28, %v3314_v27  ;;  %v3316_v34 = vld [vmem:[%s6673_s1 + $0x250] sm:$0xff] }
  0x1e   : > { %4681 = vmatpush3.bf16.msra.mxu1 %v4678_v8  ;;  %6719 = vst [vmem:[#allocation7_spill] sm:$0xff] %v5521_v23  ;;  %3986 = vmatprep.mubr.f32.mxu1 %v272_v26  ;;  %v3205_v33 = vld [vmem:[%s6673_s1 + $0xd8] sm:$0xff]  ;;  %v3206_v38 = vld [vmem:[%s6673_s1 + $0xe0] sm:$0xff]  ;;  %v3207_v39 = vld [vmem:[%s6673_s1 + $0xe8] sm:$0xff] }
  0x1f   : > { %4809 = vmatpush3.bf16.msra.mxu0 %v5486_v12  ;;  %4683 = vmatprep.subr.bf16.mxu1 %v4682_v16  ;;  %6720 = vst [vmem:[#allocation8_spill] sm:$0xff] %v5542_v31  ;;  %v3317_v35 = vld [vmem:[%s6673_s1 + $0x258] sm:$0xff]  ;;  %v4694_v36 = vpack.c.bf16 %v3205_v33, %v3204_v32  ;;  %v3318_v40 = vld [vmem:[%s6673_s1 + $0x260] sm:$0xff]  ;;  %v3319_v41 = vld [vmem:[%s6673_s1 + $0x268] sm:$0xff]  ;;  %v4698_v42 = vpack.c.bf16 %v3207_v39, %v3206_v38 }
  0x20   : > { %4811 = vmatprep.subr.bf16.mxu0 %v5500_v17  ;;  %4306 = vmatprep.mubr.f32.mxu0 %v5537_v29  ;;  %v5558_v37 = vpack.c.bf16 %v3317_v35, %v3316_v34  ;;  %v5574_v43 = vpack.c.bf16 %v3319_v41, %v3318_v40  ;;  %v3208_v44 = vld [vmem:[%s6673_s1 + $0xf0] sm:$0xff]  ;;  %v3209_v45 = vld [vmem:[%s6673_s1 + $0xf8] sm:$0xff]  ;;  %v256_v50 = vld [vmem:[%s6673_s1] sm:$0xff] }
  0x21   : > { %v3320_v46 = vld [vmem:[%s6673_s1 + $0x270] sm:$0xff]  ;;  %v3321_v47 = vld [vmem:[%s6673_s1 + $0x278] sm:$0xff]  ;;  %v4702_v48 = vpack.c.bf16 %v3209_v45, %v3208_v44  ;;  %v257_v51 = vld [vmem:[%s6673_s1 + $0x8] sm:$0xff] }
  0x22   : > { %4685 = vmatpush3.bf16.msra.mxu1 %v4682_v16  ;;  %6721 = vst [vmem:[#allocation9_spill] sm:$0xff] %v5558_v37  ;;  %6722 = vst [vmem:[#allocation10_spill] sm:$0xff] %v5574_v43  ;;  %v5590_v49 = vpack.c.bf16 %v3321_v47, %v3320_v46  ;;  %v3354_v52 = vld [vmem:[%s6673_s1 + $0x280] sm:$0xff]  ;;  %v3355_v53 = vld [vmem:[%s6673_s1 + $0x288] sm:$0xff]  ;;  %v4706_v54 = vpack.c.bf16 %v257_v51, %v256_v50 }
  0x23   : > { %4813 = vmatpush3.bf16.msra.mxu0 %v5500_v17  ;;  %4687 = vmatprep.subr.bf16.mxu1 %v4686_v22  ;;  %v4834_v55 = vpack.c.bf16 %v3355_v53, %v3354_v52  ;;  %v3356_v56 = vld [vmem:[%s6673_s1 + $0x290] sm:$0xff]  ;;  %v3357_v57 = vld [vmem:[%s6673_s1 + $0x298] sm:$0xff]  ;;  %v3275_v61 = vld [vmem:[%s5517_s7 + $0x21] sm:$0xff] }
  0x24   : > { %4815 = vmatprep.subr.bf16.mxu0 %v5521_v23  ;;  %6723 = vst [vmem:[#allocation11_spill] sm:$0xff] %v5590_v49  ;;  %v273_v58 = vld [vmem:[%s5517_s7 + $0x9] sm:$0xff]  ;;  %v259_v60 = vld [vmem:[%s6673_s1 + $0x18] sm:$0xff]  ;;  %v4838_v62 = vpack.c.bf16 %v3357_v57, %v3356_v56  ;;  %v3358_v1 = vld [vmem:[%s6673_s1 + $0x2a0] sm:$0xff] }
  0x25   : > { %v258_v59 = vld [vmem:[%s6673_s1 + $0x10] sm:$0xff]  ;;  %v3359_v2 = vld [vmem:[%s6673_s1 + $0x2a8] sm:$0xff]  ;;  %v260_v3 = vld [vmem:[%s6673_s1 + $0x20] sm:$0xff] }
  0x26   : > { %4689 = vmatpush3.bf16.msra.mxu1 %v4686_v22  ;;  %v3276_v63 = vld [vmem:[%s5517_s7 + $0x31] sm:$0xff]  ;;  %v4710_v0 = vpack.c.bf16 %v259_v60, %v258_v59  ;;  %v261_v4 = vld [vmem:[%s6673_s1 + $0x28] sm:$0xff]  ;;  %v3277_v5 = vld [vmem:[%s5517_s7 + $0x39] sm:$0xff]  ;;  %v4842_v8 = vpack.c.bf16 %v3359_v2, %v3358_v1 }
  0x27   : > { %4817 = vmatpush3.bf16.msra.mxu0 %v5521_v23  ;;  %4691 = vmatprep.subr.bf16.mxu1 %v4690_v30  ;;  %v3278_v6 = vld [vmem:[%s5517_s7 + $0x49] sm:$0xff]  ;;  %v3361_v10 = vld [vmem:[%s6673_s1 + $0x2b8] sm:$0xff]  ;;  %v4714_v11 = vpack.c.bf16 %v261_v4, %v260_v3  ;;  %v3280_v16 = vld [vmem:[%s5517_s7 + $0x61] sm:$0xff] }
  0x28   : > { %4819 = vmatprep.subr.bf16.mxu0 %v5542_v31  ;;  %v3360_v9 = vld [vmem:[%s6673_s1 + $0x2b0] sm:$0xff]  ;;  %v263_v14 = vld [vmem:[%s6673_s1 + $0x38] sm:$0xff]  ;;  %v3362_v19 = vld [vmem:[%s6673_s1 + $0x2c0] sm:$0xff] }
  0x29   : > { %v262_v13 = vld [vmem:[%s6673_s1 + $0x30] sm:$0xff]  ;;  %v4846_v18 = vpack.c.bf16 %v3361_v10, %v3360_v9  ;;  %v3363_v20 = vld [vmem:[%s6673_s1 + $0x2c8] sm:$0xff]  ;;  %v264_v22 = vld [vmem:[%s6673_s1 + $0x40] sm:$0xff] }
  0x2a   : > { %4693 = vmatpush3.bf16.msra.mxu1 %v4690_v30  ;;  %v3279_v15 = vld [vmem:[%s5517_s7 + $0x51] sm:$0xff]  ;;  %v4718_v21 = vpack.c.bf16 %v263_v14, %v262_v13  ;;  %v265_v24 = vld [vmem:[%s6673_s1 + $0x48] sm:$0xff]  ;;  %v3282_v26 = vld [vmem:[%s5517_s7 + $0x79] sm:$0xff]  ;;  %v4850_v27 = vpack.c.bf16 %v3363_v20, %v3362_v19 }
  0x2b   : > { %4821 = vmatpush3.bf16.msra.mxu0 %v5542_v31  ;;  %4695 = vmatprep.subr.bf16.mxu1 %v4694_v36  ;;  %v3281_v25 = vld [vmem:[%s5517_s7 + $0x69] sm:$0xff]  ;;  %v4722_v30 = vpack.c.bf16 %v265_v24, %v264_v22  ;;  %v267_v33 = vld [vmem:[%s6673_s1 + $0x58] sm:$0xff]  ;;  %v3283_v34 = vld [vmem:[%s5517_s7 + $0x81] sm:$0xff] }
  0x2c   : > { %4823 = vmatprep.subr.bf16.mxu0 %v5558_v37  ;;  %v3364_v28 = vld [vmem:[%s6673_s1 + $0x2d0] sm:$0xff]  ;;  %v3366_v38 = vld [vmem:[%s6673_s1 + $0x2e0] sm:$0xff]  ;;  %v3367_v39 = vld [vmem:[%s6673_s1 + $0x2e8] sm:$0xff] }
  0x2d   : > { %v266_v32 = vld [vmem:[%s6673_s1 + $0x50] sm:$0xff]  ;;  %v268_v41 = vld [vmem:[%s6673_s1 + $0x60] sm:$0xff]  ;;  %v4858_v46 = vpack.c.bf16 %v3367_v39, %v3366_v38  ;;  %v271_v52 = vld [vmem:[%s6673_s1 + $0x78] sm:$0xff] }
  0x2e   : > { %4697 = vmatpush3.bf16.msra.mxu1 %v4694_v36  ;;  %v5679_v35 = vld [vmem:[%s5517_s7 + $0x91] sm:$0xff]  ;;  %v4726_v40 = vpack.c.bf16 %v267_v33, %v266_v32  ;;  %v3285_v44 = vld [vmem:[%s5517_s7 + $0x99] sm:$0xff]  ;;  %v3286_v45 = vld [vmem:[%s5517_s7 + $0xa9] sm:$0xff] }
  0x2f   : > { %4825 = vmatpush3.bf16.msra.mxu0 %v5558_v37  ;;  %4699 = vmatprep.subr.bf16.mxu1 %v4698_v42  ;;  %v3368_v47 = vld [vmem:[%s6673_s1 + $0x2f0] sm:$0xff]  ;;  %v3402_v56 = vld [vmem:[%s6673_s1 + $0x300] sm:$0xff]  ;;  %v3403_v57 = vld [vmem:[%s6673_s1 + $0x308] sm:$0xff] }
  0x30   : > { %4827 = vmatprep.subr.bf16.mxu0 %v5574_v43  ;;  %v270_v51 = vld [vmem:[%s6673_s1 + $0x70] sm:$0xff]  ;;  %v3210_v59 = vld [vmem:[%s6673_s1 + $0x100] sm:$0xff]  ;;  %v3211_v60 = vld [vmem:[%s6673_s1 + $0x108] sm:$0xff] }
  0x31   : > { %v3287_v53 = vld [vmem:[%s5517_s7 + $0xb1] sm:$0xff]  ;;  %v5738_v2 = vpack.c.bf16 %v3211_v60, %v3210_v59  ;;  %v5744_v3 = vld [vmem:[%s5517_s7 + $0x22] sm:$0xff]  ;;  %v5747_v4 = vld [vmem:[%s5517_s7 + $0xd9] sm:$0xff] }
  0x32   : > { %4701 = vmatpush3.bf16.msra.mxu1 %v4698_v42  ;;  %v269_v42 = vld [vmem:[%s6673_s1 + $0x68] sm:$0xff]  ;;  %v3405_v1 = vld [vmem:[%s6673_s1 + $0x318] sm:$0xff]  ;;  %v3412_v33 = vld [vmem:[%s6673_s1 + $0x350] sm:$0xff] }
  0x33   : > { %4829 = vmatpush3.bf16.msra.mxu0 %v5574_v43  ;;  %4703 = vmatprep.subr.bf16.mxu1 %v4702_v48  ;;  %v4730_v50 = vpack.c.bf16 %v269_v42, %v268_v41  ;;  %v3407_v9 = vld [vmem:[%s6673_s1 + $0x328] sm:$0xff]  ;;  %v5770_v13 = vld [vmem:[%s5517_s7 + $0xf1] sm:$0xff]  ;;  %v5785_v19 = vld [vmem:[%s5517_s7 + $0xf9] sm:$0xff] }
  0x34   : > { %4831 = vmatprep.subr.bf16.mxu0 %v5590_v49  ;;  %v5763_v10 = vld [vmem:[%s5517_s7 + $0xe1] sm:$0xff]  ;;  %v5773_v14 = vld [vmem:[%s5517_s7 + $0x4a] sm:$0xff]  ;;  %v5789_v20 = vld [vmem:[%s5517_s7 + $0x52] sm:$0xff] }
  0x35   : > { %v5795_v22 = vld [vmem:[%s5517_s7 + $0x62] sm:$0xff]  ;;  %v5836_v39 = vld [vmem:[%s5517_s7 + $0x139] sm:$0xff] }
  0x36   : > { %4705 = vmatpush3.bf16.msra.mxu1 %v4702_v48  ;;  %v3369_v48 = vld [vmem:[%s6673_s1 + $0x2f8] sm:$0xff]  ;;  %v5833_v38 = vld [vmem:[%s5517_s7 + $0x82] sm:$0xff]  ;;  %6728 = vst [vmem:[#allocation16_spill] sm:$0xff] %v5836_v39 }
  0x37   : > { %4833 = vmatpush3.bf16.msra.mxu0 %v5590_v49  ;;  %4707 = vmatprep.subr.bf16.mxu1 %v4706_v54  ;;  %v3414_v42 = vld [vmem:[%s6673_s1 + $0x360] sm:$0xff]  ;;  %v3451_v60 = vld [vmem:[%s6673_s1 + $0x388] sm:$0xff]  ;;  %v3221_v49 = vld [vmem:[%s6673_s1 + $0x158] sm:$0xff] }
  0x38   : > { %4835 = vmatprep.subr.bf16.mxu0 %v4834_v55  ;;  %v3450_v59 = vld [vmem:[%s6673_s1 + $0x380] sm:$0xff]  ;;  %v6013_v43 = vld [vmem:[%s5517_s7 + $0x152] sm:$0xff]  ;;  %v3259_v17 = vld [vmem:[%s6673_s1 + $0x188] sm:$0xff] }
  0x39   : > { %3987 = vmatmul.mubr.f32.vlgmr.msra.gmra.mrb[0].mxu1 %v273_v58  ;;  %v4734_v58 = vpack.c.bf16 %v271_v52, %v270_v51  ;;  %v3416_v51 = vld [vmem:[%s6673_s1 + $0x370] sm:$0xff]  ;;  %v3417_v52 = vld [vmem:[%s6673_s1 + $0x378] sm:$0xff]  ;;  %v3222_v37 = vld [vmem:[%s6673_s1 + $0x160] sm:$0xff] }
  0x3a   : > { %4307 = vmatmul.mubr.f32.vlgmr.msra.gmra.mrb[0].mxu0 %v3275_v61  ;;  %4709 = vmatpush3.bf16.msra.mxu1 %v4706_v54  ;;  %v5711_v54 = vld [vmem:[%s5517_s7 + $0xc1] sm:$0xff]  ;;  %v3453_v12 = vld [vmem:[%s6673_s1 + $0x398] sm:$0xff] }
  0x3b   : > { %4837 = vmatpush3.bf16.msra.mxu0 %v4834_v55  ;;  %3989 = vmatprep.mubr.f32.mxu1 %v5537_v29  ;;  %v3365_v29 = vld [vmem:[%s6673_s1 + $0x2d8] sm:$0xff]  ;;  %v4862_v55 = vpack.c.bf16 %v3369_v48, %v3368_v47  ;;  %v5861_v48 = vld [vmem:[%s5517_s7 + $0xaa] sm:$0xff]  ;;  %v3352_v23 = vld [vmem:[%s5517_s7 + $0x182] sm:$0xff] }
  0x3c   : > { %4309 = vmatprep.mubr.f32.mxu0 %v3276_v63  ;;  %4839 = vmatprep.subr.bf16.mxu0 %v4838_v62  ;;  %v4854_v36 = vpack.c.bf16 %v3365_v29, %v3364_v28  ;;  %v5811_v28 = vld [vmem:[%s5517_s7 + $0x6a] sm:$0xff]  ;;  %v5814_v29 = vld [vmem:[%s5517_s7 + $0x121] sm:$0xff] }
  0x3d   : > { %3990 = vmatmul.mubr.f32.gmra.mrb[2].mxu1 %v3275_v61  ;;  %4711 = vmatprep.subr.bf16.mxu1 %v4710_v0  ;;  %v5727_v61 = vld [vmem:[%s5517_s7 + $0xc9] sm:$0xff]  ;;  %6726 = vst [vmem:[#allocation14_spill] sm:$0xff] %v5814_v29  ;;  %v5858_v47 = vld [vmem:[%s5517_s7 + $0x151] sm:$0xff] }
  0x3e   : > { %4310 = vmatmul.mubr.f32.gmra.mrb[2].mxu0 %v3277_v5  ;;  %3992 = vmatprep.mubr.f32.mxu1 %v3276_v63  ;;  %v4866_v63 = vpack.c.bf16 %v3403_v57, %v3402_v56  ;;  %6730 = vst [vmem:[#allocation18_spill] sm:$0xff] %v5858_v47  ;;  %v5880_v56 = vld [vmem:[%s5517_s7 + $0x169] sm:$0xff] }
  0x3f   : > { %4841 = vmatpush3.bf16.msra.mxu0 %v4838_v62  ;;  %4312 = vmatprep.mubr.f32.mxu0 %v3278_v6  ;;  %v5730_v62 = vld [vmem:[%s5517_s7 + $0x1a] sm:$0xff]  ;;  %6732 = vst [vmem:[#allocation20_spill] sm:$0xff] %v5880_v56  ;;  %v5883_v57 = vld [vmem:[%s5517_s7 + $0xc2] sm:$0xff] }
  0x40   : > { %4843 = vmatprep.subr.bf16.mxu0 %v4842_v8  ;;  %4713 = vmatpush3.bf16.msra.mxu1 %v4710_v0  ;;  %v3404_v0 = vld [vmem:[%s6673_s1 + $0x310] sm:$0xff] }
  0x41   : > { %3993 = vmatmul.mubr.f32.gmra.mrb[4].mxu1 %v3277_v5  ;;  %4715 = vmatprep.subr.bf16.mxu1 %v4714_v11  ;;  %v5750_v5 = vld [vmem:[%s5517_s7 + $0x32] sm:$0xff] }
  0x42   : > { %4313 = vmatmul.mubr.f32.gmra.mrb[4].mxu0 %v3279_v15  ;;  %3995 = vmatprep.mubr.f32.mxu1 %v3278_v6  ;;  %v4870_v6 = vpack.c.bf16 %v3405_v1, %v3404_v0  ;;  %v5899_v0 = vld [vmem:[%s5517_s7 + $0xca] sm:$0xff]  ;;  %v224_v1 = vld [vmem:[%s5517_s7] sm:$0xff] }
  0x43   : > { %4845 = vmatpush3.bf16.msra.mxu0 %v4842_v8  ;;  %4315 = vmatprep.mubr.f32.mxu0 %v3280_v16  ;;  %v3406_v8 = vld [vmem:[%s6673_s1 + $0x320] sm:$0xff] }
  0x44   : > { %4847 = vmatprep.subr.bf16.mxu0 %v4846_v18  ;;  %4717 = vmatpush3.bf16.msra.mxu1 %v4714_v11  ;;  %v5767_v11 = vld [vmem:[%s5517_s7 + $0x3a] sm:$0xff] }
  0x45   : > { %3996 = vmatmul.mubr.f32.gmra.mrb[6].mxu1 %v3279_v15  ;;  %4719 = vmatprep.subr.bf16.mxu1 %v4718_v21  ;;  %v4874_v15 = vpack.c.bf16 %v3407_v9, %v3406_v8  ;;  %v5905_v8 = vpack.c.bf16 %v3451_v60, %v3450_v59  ;;  %v3212_v9 = vld [vmem:[%s6673_s1 + $0x110] sm:$0xff]  ;;  %v5966_v59 = vld [vmem:[%s5517_s7 + $0x48] sm:$0xff] }
  0x46   : > { %4316 = vmatmul.mubr.f32.gmra.mrb[6].mxu0 %v3281_v25  ;;  %3998 = vmatprep.mubr.f32.mxu1 %v3280_v16  ;;  %v3408_v16 = vld [vmem:[%s6673_s1 + $0x330] sm:$0xff]  ;;  %6736 = vst [vmem:[#allocation24_spill] sm:$0xff] %v5966_v59  ;;  %v5969_v60 = vld [vmem:[%s5517_s7 + $0x122] sm:$0xff] }
  0x47   : > { %4849 = vmatpush3.bf16.msra.mxu0 %v4846_v18  ;;  %4318 = vmatprep.mubr.f32.mxu0 %v3282_v26  ;;  %v3409_v18 = vld [vmem:[%s6673_s1 + $0x338] sm:$0xff] }
  0x48   : > { %4851 = vmatprep.subr.bf16.mxu0 %v4850_v27  ;;  %4721 = vmatpush3.bf16.msra.mxu1 %v4718_v21  ;;  %v5792_v21 = vld [vmem:[%s5517_s7 + $0x109] sm:$0xff]  ;;  %v4878_v24 = vpack.c.bf16 %v3409_v18, %v3408_v16 }
  0x49   : > { %3999 = vmatmul.mubr.f32.gmra.mrb[8].mxu1 %v3281_v25  ;;  %4723 = vmatprep.subr.bf16.mxu1 %v4722_v30  ;;  %6724 = vst [vmem:[#allocation12_spill] sm:$0xff] %v5792_v21  ;;  %v3410_v25 = vld [vmem:[%s6673_s1 + $0x340] sm:$0xff]  ;;  %v225_v16 = vld [vmem:[%s5517_s7 + $0x8] sm:$0xff] }
  0x4a   : > { %4319 = vmatmul.mubr.f32.gmra.mrb[8].mxu0 %v3283_v34  ;;  %4001 = vmatprep.mubr.f32.mxu1 %v3282_v26  ;;  %v3411_v26 = vld [vmem:[%s6673_s1 + $0x348] sm:$0xff] }
  0x4b   : > { %4853 = vmatpush3.bf16.msra.mxu0 %v4850_v27  ;;  %4321 = vmatprep.mubr.f32.mxu0 %v5679_v35  ;;  %v5807_v27 = vld [vmem:[%s5517_s7 + $0x111] sm:$0xff]  ;;  %v4882_v32 = vpack.c.bf16 %v3411_v26, %v3410_v25  ;;  %v5918_v18 = vld [vmem:[%s5517_s7 + $0xe2] sm:$0xff] }
  0x4c   : > { %4855 = vmatprep.subr.bf16.mxu0 %v4854_v36  ;;  %4725 = vmatpush3.bf16.msra.mxu1 %v4722_v30  ;;  %6725 = vst [vmem:[#allocation13_spill] sm:$0xff] %v5807_v27  ;;  %v5817_v30 = vld [vmem:[%s5517_s7 + $0x7a] sm:$0xff]  ;;  %v5924_v25 = vld [vmem:[%s5517_s7 + $0xf2] sm:$0xff] }
  0x4d   : > { %4002 = vmatmul.mubr.f32.gmra.mrb[10].mxu1 %v3283_v34  ;;  %4727 = vmatprep.subr.bf16.mxu1 %v4726_v40  ;;  %v3413_v34 = vld [vmem:[%s6673_s1 + $0x358] sm:$0xff] }
  0x4e   : > { %4322 = vmatmul.mubr.f32.gmra.mrb[10].mxu0 %v3285_v44  ;;  %4004 = vmatprep.mubr.f32.mxu1 %v5679_v35  ;;  %v4886_v41 = vpack.c.bf16 %v3413_v34, %v3412_v33  ;;  %v3215_v33 = vld [vmem:[%s6673_s1 + $0x128] sm:$0xff]  ;;  %v5936_v34 = vld [vmem:[%s5517_s7 + $0x20] sm:$0xff] }
  0x4f   : > { %4857 = vmatpush3.bf16.msra.mxu0 %v4854_v36  ;;  %4324 = vmatprep.mubr.f32.mxu0 %v3286_v45  ;;  %v5829_v36 = vld [vmem:[%s5517_s7 + $0x129] sm:$0xff] }
  0x50   : > { %4859 = vmatprep.subr.bf16.mxu0 %v4858_v46  ;;  %4729 = vmatpush3.bf16.msra.mxu1 %v4726_v40  ;;  %6727 = vst [vmem:[#allocation15_spill] sm:$0xff] %v5829_v36  ;;  %v5839_v40 = vld [vmem:[%s5517_s7 + $0x92] sm:$0xff] }
  0x51   : > { %4005 = vmatmul.mubr.f32.gmra.mrb[12].mxu1 %v3285_v44  ;;  %4731 = vmatprep.subr.bf16.mxu1 %v4730_v50  ;;  %v3415_v44 = vld [vmem:[%s6673_s1 + $0x368] sm:$0xff] }
  0x52   : > { %4325 = vmatmul.mubr.f32.gmra.mrb[12].mxu0 %v3287_v53  ;;  %4007 = vmatprep.mubr.f32.mxu1 %v3286_v45  ;;  %v5851_v45 = vld [vmem:[%s5517_s7 + $0x141] sm:$0xff] }
  0x53   : > { %4861 = vmatpush3.bf16.msra.mxu0 %v4858_v46  ;;  %4327 = vmatprep.mubr.f32.mxu0 %v5711_v54  ;;  %6729 = vst [vmem:[#allocation17_spill] sm:$0xff] %v5851_v45  ;;  %v5855_v46 = vld [vmem:[%s5517_s7 + $0x9a] sm:$0xff] }
  0x54   : > { %4863 = vmatprep.subr.bf16.mxu0 %v4862_v55  ;;  %4733 = vmatpush3.bf16.msra.mxu1 %v4730_v50  ;;  %v4890_v50 = vpack.c.bf16 %v3415_v44, %v3414_v42  ;;  %v5944_v42 = vld [vmem:[%s5517_s7 + $0x30] sm:$0xff] }
  0x55   : > { %4008 = vmatmul.mubr.f32.gmra.mrb[14].mxu1 %v3287_v53  ;;  %4735 = vmatprep.subr.bf16.mxu1 %v4734_v58  ;;  %v5873_v53 = vld [vmem:[%s5517_s7 + $0x159] sm:$0xff]  ;;  %6734 = vst [vmem:[#allocation22_spill] sm:$0xff] %v5944_v42  ;;  %v5947_v44 = vld [vmem:[%s5517_s7 + $0x10a] sm:$0xff] }
  0x56   : > { %4328 = vmatmul.mubr.f32.gmra.mrb[14].mxu0 %v5727_v61  ;;  %4010 = vmatprep.mubr.f32.mxu1 %v5711_v54  ;;  %6731 = vst [vmem:[#allocation19_spill] sm:$0xff] %v5873_v53 }
  0x57   : > { %4865 = vmatpush3.bf16.msra.mxu0 %v4862_v55  ;;  %4386 = vmatprep.mubr.f32.mxu0 %v5730_v62  ;;  %v5877_v55 = vld [vmem:[%s5517_s7 + $0xb2] sm:$0xff] }
  0x58   : > { %4867 = vmatprep.subr.bf16.mxu0 %v4866_v63  ;;  %4737 = vmatpush3.bf16.msra.mxu1 %v4734_v58  ;;  %v4894_v58 = vpack.c.bf16 %v3417_v52, %v3416_v51  ;;  %v3217_v51 = vld [vmem:[%s6673_s1 + $0x138] sm:$0xff] }
  0x59   : > { %4011 = vmatmul.mubr.f32.gmra.mrb[16].mxu1 %v5727_v61  ;;  %4739 = vmatprep.subr.bf16.mxu1 %v5738_v2  ;;  %v5959_v52 = vld [vmem:[%s5517_s7 + $0x38] sm:$0xff] }
  0x5a   : > { %4387 = vmatmul.mubr.f32.vlgmr.msra.gmra.mrb[0].mxu0 %v5744_v3  ;;  %4013 = vmatprep.mubr.f32.mxu1 %v5747_v4  ;;  %6735 = vst [vmem:[#allocation23_spill] sm:$0xff] %v5959_v52 }
  0x5b   : > { %4869 = vmatpush3.bf16.msra.mxu0 %v4866_v63  ;;  %4389 = vmatprep.mubr.f32.mxu0 %v5750_v5  ;;  %v5895_v63 = vld [vmem:[%s5517_s7 + $0x171] sm:$0xff] }
  0x5c   : > { %4871 = vmatprep.subr.bf16.mxu0 %v4870_v6  ;;  %6733 = vst [vmem:[#allocation21_spill] sm:$0xff] %v5895_v63 }
  0x5d   : > { %4014 = vmatmul.mubr.f32.gmra.mrb[18].mxu1 %v5763_v10 }
  0x5e   : > { %4390 = vmatmul.mubr.f32.gmra.mrb[2].mxu0 %v5767_v11  ;;  %4016 = vmatprep.mubr.f32.mxu1 %v5770_v13 }
  0x5f   : > { %4392 = vmatprep.mubr.f32.mxu0 %v5773_v14  ;;  %4873 = vmatpush3.bf16.msra.mxu0 %v4870_v6  ;;  %v5903_v6 = vld [vmem:[%s5517_s7 + $0xda] sm:$0xff] }
  0x60   : > { %4875 = vmatprep.subr.bf16.mxu0 %v4874_v15 }
  0x61   : > { %4017 = vmatmul.mubr.f32.gmra.mrb[20].mxu1 %v5785_v19 }
  0x62   : > { %4393 = vmatmul.mubr.f32.gmra.mrb[4].mxu0 %v5789_v20  ;;  %4019 = vmatprep.mubr.f32.mxu1 %v5792_v21  ;;  %v3457_v21 = vld [vmem:[%s6673_s1 + $0x3b8] sm:$0xff] }
  0x63   : > { %4395 = vmatprep.mubr.f32.mxu0 %v5795_v22  ;;  %4877 = vmatpush3.bf16.msra.mxu0 %v4874_v15  ;;  %v3213_v15 = vld [vmem:[%s6673_s1 + $0x118] sm:$0xff] }
  0x64   : > { %4879 = vmatprep.subr.bf16.mxu0 %v4878_v24  ;;  %v4742_v26 = vpack.c.bf16 %v3213_v15, %v3212_v9  ;;  %v3218_v9 = vld [vmem:[%s6673_s1 + $0x140] sm:$0xff]  ;;  %v3219_v15 = vld [vmem:[%s6673_s1 + $0x148] sm:$0xff] }
  0x65   : > { %4020 = vmatmul.mubr.f32.gmra.mrb[22].mxu1 %v5807_v27  ;;  %v3452_v27 = vld [vmem:[%s6673_s1 + $0x390] sm:$0xff] }
  0x66   : > { %4396 = vmatmul.mubr.f32.gmra.mrb[6].mxu0 %v5811_v28  ;;  %4022 = vmatprep.mubr.f32.mxu1 %v5814_v29 }
  0x67   : > { %4398 = vmatprep.mubr.f32.mxu0 %v5817_v30  ;;  %4881 = vmatpush3.bf16.msra.mxu0 %v4878_v24  ;;  %v5921_v24 = vld [vmem:[%s5517_s7 + $0x18] sm:$0xff] }
  0x68   : > { %4883 = vmatprep.subr.bf16.mxu0 %v4882_v32 }
  0x69   : > { %4023 = vmatmul.mubr.f32.gmra.mrb[24].mxu1 %v5829_v36  ;;  %v3258_v36 = vld [vmem:[%s6673_s1 + $0x180] sm:$0xff] }
  0x6a   : > { %4399 = vmatmul.mubr.f32.gmra.mrb[8].mxu0 %v5833_v38  ;;  %4025 = vmatprep.mubr.f32.mxu1 %v5836_v39  ;;  %v6073_v29 = vpack.c.bf16 %v3259_v17, %v3258_v36  ;;  %v6088_v17 = vld [vmem:[%s5517_s7 + $0xd8] sm:$0xff]  ;;  %v3454_v36 = vld [vmem:[%s6673_s1 + $0x3a0] sm:$0xff] }
  0x6b   : > { %4401 = vmatprep.mubr.f32.mxu0 %v5839_v40  ;;  %4885 = vmatpush3.bf16.msra.mxu0 %v4882_v32  ;;  %v3214_v32 = vld [vmem:[%s6673_s1 + $0x120] sm:$0xff] }
  0x6c   : > { %4887 = vmatprep.subr.bf16.mxu0 %v4886_v41 }
  0x6d   : > { %4026 = vmatmul.mubr.f32.gmra.mrb[26].mxu1 %v5851_v45  ;;  %v3225_v45 = vld [vmem:[%s6673_s1 + $0x178] sm:$0xff] }
  0x6e   : > { %4402 = vmatmul.mubr.f32.gmra.mrb[10].mxu0 %v5855_v46  ;;  %4028 = vmatprep.mubr.f32.mxu1 %v5858_v47  ;;  %v3224_v47 = vld [vmem:[%s6673_s1 + $0x170] sm:$0xff] }
  0x6f   : > { %4404 = vmatprep.mubr.f32.mxu0 %v5861_v48  ;;  %4889 = vmatpush3.bf16.msra.mxu0 %v4886_v41  ;;  %v5941_v41 = vld [vmem:[%s5517_s7 + $0xfa] sm:$0xff]  ;;  %v4766_v39 = vpack.c.bf16 %v3225_v45, %v3224_v47  ;;  %v3353_v45 = vld [vmem:[%s5517_s7 + $0x18a] sm:$0xff] }
  0x70   : > { %4891 = vmatprep.subr.bf16.mxu0 %v4890_v50  ;;  %v6071_v47 = vld [vmem:[%s5517_s7 + $0xc0] sm:$0xff] }
  0x71   : > { %4029 = vmatmul.mubr.f32.gmra.mrb[28].mxu1 %v5873_v53  ;;  %v6035_v53 = vld [vmem:[%s5517_s7 + $0x16a] sm:$0xff]  ;;  %6746 = vst [vmem:[#allocation34_spill] sm:$0xff] %v6071_v47 }
  0x72   : > { %4405 = vmatmul.mubr.f32.gmra.mrb[12].mxu0 %v5877_v55  ;;  %4031 = vmatprep.mubr.f32.mxu1 %v5880_v56  ;;  %v3223_v56 = vld [vmem:[%s6673_s1 + $0x168] sm:$0xff] }
  0x73   : > { %4407 = vmatprep.mubr.f32.mxu0 %v5883_v57  ;;  %4893 = vmatpush3.bf16.msra.mxu0 %v4890_v50  ;;  %v4746_v50 = vpack.c.bf16 %v3215_v33, %v3214_v32  ;;  %v5988_v32 = vld [vmem:[%s5517_s7 + $0x60] sm:$0xff]  ;;  %v4762_v31 = vpack.c.bf16 %v3223_v56, %v3222_v37  ;;  %v6051_v37 = vld [vmem:[%s5517_s7 + $0x172] sm:$0xff]  ;;  %v6054_v56 = vld [vmem:[%s5517_s7 + $0xa8] sm:$0xff] }
  0x74   : > { %4895 = vmatprep.subr.bf16.mxu0 %v4894_v58  ;;  %6738 = vst [vmem:[#allocation26_spill] sm:$0xff] %v5988_v32  ;;  %v5991_v33 = vld [vmem:[%s5517_s7 + $0x13a] sm:$0xff]  ;;  %6744 = vst [vmem:[#allocation32_spill] sm:$0xff] %v6054_v56 }
  0x75   : > { %4032 = vmatmul.mubr.f32.gmra.mrb[30].mxu1 %v5895_v63 }
  0x76   : > { %4408 = vmatmul.mubr.f32.gmra.mrb[14].mxu0 %v5899_v0  ;;  %4066 = vmatprep.mubr.f32.mxu1 %v224_v1 }
  0x77   : > { %4410 = vmatprep.mubr.f32.mxu0 %v5903_v6  ;;  %4897 = vmatpush3.bf16.msra.mxu0 %v4894_v58  ;;  %v5963_v58 = vld [vmem:[%s5517_s7 + $0x112] sm:$0xff] }
  0x78   : > { %4899 = vmatprep.subr.bf16.mxu0 %v5905_v8 }
  0x79   : > { %4067 = vmatmul.mubr.f32.vlgmr.msra.gmra.mrb[0].mxu1 %v225_v16  ;;  %v5981_v16 = vld [vmem:[%s5517_s7 + $0x50] sm:$0xff] }
  0x7a   : > { %4411 = vmatmul.mubr.f32.gmra.mrb[16].mxu0 %v5918_v18  ;;  %4741 = vmatpush3.bf16.msra.mxu1 %v5738_v2  ;;  %v3216_v2 = vld [vmem:[%s6673_s1 + $0x130] sm:$0xff]  ;;  %6737 = vst [vmem:[#allocation25_spill] sm:$0xff] %v5981_v16 }
  0x7b   : > { %4069 = vmatprep.mubr.f32.mxu1 %v5921_v24  ;;  %4413 = vmatprep.mubr.f32.mxu0 %v5924_v25  ;;  %v4750_v1 = vpack.c.bf16 %v3217_v51, %v3216_v2  ;;  %v4754_v2 = vpack.c.bf16 %v3219_v15, %v3218_v9  ;;  %v3220_v51 = vld [vmem:[%s6673_s1 + $0x150] sm:$0xff]  ;;  %v6007_v9 = vld [vmem:[%s5517_s7 + $0x142] sm:$0xff]  ;;  %v6010_v15 = vld [vmem:[%s5517_s7 + $0x78] sm:$0xff] }
  0x7c   : > { %4743 = vmatprep.subr.bf16.mxu1 %v4742_v26  ;;  %6740 = vst [vmem:[#allocation28_spill] sm:$0xff] %v6010_v15  ;;  %v4758_v63 = vpack.c.bf16 %v3221_v49, %v3220_v51  ;;  %v6029_v49 = vld [vmem:[%s5517_s7 + $0x15a] sm:$0xff]  ;;  %v6032_v51 = vld [vmem:[%s5517_s7 + $0x90] sm:$0xff] }
  0x7d   : > { %4070 = vmatmul.mubr.f32.gmra.mrb[2].mxu1 %v5936_v34  ;;  %6742 = vst [vmem:[#allocation30_spill] sm:$0xff] %v6032_v51 }
  0x7e   : > { %4414 = vmatmul.mubr.f32.gmra.mrb[18].mxu0 %v5941_v41  ;;  %4072 = vmatprep.mubr.f32.mxu1 %v5944_v42 }
  0x7f   : > { %4416 = vmatprep.mubr.f32.mxu0 %v5947_v44  ;;  %4745 = vmatpush3.bf16.msra.mxu1 %v4742_v26  ;;  %v5985_v26 = vld [vmem:[%s5517_s7 + $0x12a] sm:$0xff] }
  0x80   : > { %4747 = vmatprep.subr.bf16.mxu1 %v4746_v50 }
  0x81   : > { %4073 = vmatmul.mubr.f32.gmra.mrb[4].mxu1 %v5959_v52 }
  0x82   : > { %4417 = vmatmul.mubr.f32.gmra.mrb[20].mxu0 %v5963_v58  ;;  %4075 = vmatprep.mubr.f32.mxu1 %v5966_v59 }
  0x83   : > { %4419 = vmatprep.mubr.f32.mxu0 %v5969_v60  ;;  %4749 = vmatpush3.bf16.msra.mxu1 %v4746_v50  ;;  %v6003_v50 = vld [vmem:[%s5517_s7 + $0x68] sm:$0xff] }
  0x84   : > { %4751 = vmatprep.subr.bf16.mxu1 %v4750_v1  ;;  %6739 = vst [vmem:[#allocation27_spill] sm:$0xff] %v6003_v50 }
  0x85   : > { %4076 = vmatmul.mubr.f32.gmra.mrb[6].mxu1 %v5981_v16 }
  0x86   : > { %4420 = vmatmul.mubr.f32.gmra.mrb[22].mxu0 %v5985_v26  ;;  %4078 = vmatprep.mubr.f32.mxu1 %v5988_v32 }
  0x87   : > { %4422 = vmatprep.mubr.f32.mxu0 %v5991_v33  ;;  %4753 = vmatpush3.bf16.msra.mxu1 %v4750_v1  ;;  %v6025_v1 = vld [vmem:[%s5517_s7 + $0x80] sm:$0xff] }
  0x88   : > { %4755 = vmatprep.subr.bf16.mxu1 %v4754_v2  ;;  %6741 = vst [vmem:[#allocation29_spill] sm:$0xff] %v6025_v1 }
  0x89   : > { %4079 = vmatmul.mubr.f32.gmra.mrb[8].mxu1 %v6003_v50 }
  0x8a   : > { %4423 = vmatmul.mubr.f32.gmra.mrb[24].mxu0 %v6007_v9  ;;  %4081 = vmatprep.mubr.f32.mxu1 %v6010_v15 }
  0x8b   : > { %4425 = vmatprep.mubr.f32.mxu0 %v6013_v43  ;;  %4757 = vmatpush3.bf16.msra.mxu1 %v4754_v2  ;;  %v6047_v2 = vld [vmem:[%s5517_s7 + $0x98] sm:$0xff] }
  0x8c   : > { %4759 = vmatprep.subr.bf16.mxu1 %v4758_v63  ;;  %6743 = vst [vmem:[#allocation31_spill] sm:$0xff] %v6047_v2 }
  0x8d   : > { %4082 = vmatmul.mubr.f32.gmra.mrb[10].mxu1 %v6025_v1 }
  0x8e   : > { %4426 = vmatmul.mubr.f32.gmra.mrb[26].mxu0 %v6029_v49  ;;  %4084 = vmatprep.mubr.f32.mxu1 %v6032_v51 }
  0x8f   : > { %4428 = vmatprep.mubr.f32.mxu0 %v6035_v53  ;;  %4761 = vmatpush3.bf16.msra.mxu1 %v4758_v63  ;;  %v6067_v63 = vld [vmem:[%s5517_s7 + $0xb0] sm:$0xff] }
  0x90   : > { %4763 = vmatprep.subr.bf16.mxu1 %v4762_v31  ;;  %6745 = vst [vmem:[#allocation33_spill] sm:$0xff] %v6067_v63 }
  0x91   : > { %4085 = vmatmul.mubr.f32.gmra.mrb[12].mxu1 %v6047_v2 }
  0x92   : > { %4429 = vmatmul.mubr.f32.gmra.mrb[28].mxu0 %v6051_v37  ;;  %4087 = vmatprep.mubr.f32.mxu1 %v6054_v56 }
  0x93   : > { %4431 = vmatprep.mubr.f32.mxu0 %v3352_v23  ;;  %4765 = vmatpush3.bf16.msra.mxu1 %v4762_v31  ;;  %v6084_v23 = vld [vmem:[%s5517_s7 + $0xc8] sm:$0xff]  ;;  %v4902_v31 = vpack.c.bf16 %v3453_v12, %v3452_v27  ;;  %v6106_v12 = vld [vmem:[%s5517_s7 + $0xf0] sm:$0xff] }
  0x94   : > { %4767 = vmatprep.subr.bf16.mxu1 %v4766_v39  ;;  %6747 = vst [vmem:[#allocation35_spill] sm:$0xff] %v6084_v23 }
  0x95   : > { %4088 = vmatmul.mubr.f32.gmra.mrb[14].mxu1 %v6067_v63 }
  0x96   : > { %4432 = vmatmul.mubr.f32.gmra.mrb[30].mxu0 %v3353_v45  ;;  %4090 = vmatprep.mubr.f32.mxu1 %v6071_v47  ;;  %v3455_v45 = vld [vmem:[%s6673_s1 + $0x3a8] sm:$0xff] }
  0x97   : > { %4466 = vmatprep.mubr.f32.mxu0 %v5944_v42  ;;  %4769 = vmatpush3.bf16.msra.mxu1 %v4766_v39  ;;  %v6101_v39 = vld [vmem:[%s5517_s7 + $0xe0] sm:$0xff]  ;;  %v4906_v27 = vpack.c.bf16 %v3455_v45, %v3454_v36  ;;  %v6122_v36 = vld [vmem:[%s5517_s7 + $0x108] sm:$0xff] }
  0x98   : > { %4771 = vmatprep.subr.bf16.mxu1 %v6073_v29  ;;  %v772_v42 = vld [vmem:[%s5517_s7 + $0xa] sm:$0xff] }
  0x99   : > { %4091 = vmatmul.mubr.f32.gmra.mrb[16].mxu1 %v6084_v23 }
  0x9a   : > { %4467 = vmatmul.mubr.f32.vlgmr.msra.gmra.mrb[0].mxu0 %v5959_v52  ;;  %4093 = vmatprep.mubr.f32.mxu1 %v6088_v17  ;;  %v3456_v52 = vld [vmem:[%s6673_s1 + $0x3b0] sm:$0xff] }
  0x9b   : > { %4901 = vmatpush3.bf16.msra.mxu0 %v5905_v8  ;;  %4469 = vmatprep.mubr.f32.mxu0 %v5966_v59  ;;  %v6118_v8 = vld [vmem:[%s5517_s7 + $0xf8] sm:$0xff]  ;;  %v4910_v45 = vpack.c.bf16 %v3457_v21, %v3456_v52  ;;  %v3458_v59 = vld [vmem:[%s6673_s1 + $0x3c0] sm:$0xff] }
  0x9c   : > { %4903 = vmatprep.subr.bf16.mxu0 %v4902_v31  ;;  %v6138_v21 = vld [vmem:[%s5517_s7 + $0x120] sm:$0xff] }
  0x9d   : > { %4094 = vmatmul.mubr.f32.gmra.mrb[18].mxu1 %v6101_v39 }
  0x9e   : > { %4470 = vmatmul.mubr.f32.gmra.mrb[2].mxu0 %v5981_v16  ;;  %4096 = vmatprep.mubr.f32.mxu1 %v6106_v12  ;;  %v3459_v16 = vld [vmem:[%s6673_s1 + $0x3c8] sm:$0xff] }
  0x9f   : > { %4472 = vmatprep.mubr.f32.mxu0 %v5988_v32  ;;  %4905 = vmatpush3.bf16.msra.mxu0 %v4902_v31  ;;  %v6134_v31 = vld [vmem:[%s5517_s7 + $0x110] sm:$0xff]  ;;  %v4914_v52 = vpack.c.bf16 %v3459_v16, %v3458_v59  ;;  %v6154_v59 = vld [vmem:[%s5517_s7 + $0x138] sm:$0xff] }
  0xa0   : > { %4907 = vmatprep.subr.bf16.mxu0 %v4906_v27  ;;  %v3460_v32 = vld [vmem:[%s6673_s1 + $0x3d0] sm:$0xff] }
  0xa1   : > { %4097 = vmatmul.mubr.f32.gmra.mrb[20].mxu1 %v6118_v8 }
  0xa2   : > { %4473 = vmatmul.mubr.f32.gmra.mrb[4].mxu0 %v6003_v50  ;;  %4099 = vmatprep.mubr.f32.mxu1 %v6122_v36  ;;  %v3461_v50 = vld [vmem:[%s6673_s1 + $0x3d8] sm:$0xff] }
  0xa3   : > { %4475 = vmatprep.mubr.f32.mxu0 %v6010_v15  ;;  %4909 = vmatpush3.bf16.msra.mxu0 %v4906_v27  ;;  %v6150_v15 = vld [vmem:[%s5517_s7 + $0x128] sm:$0xff]  ;;  %v4918_v16 = vpack.c.bf16 %v3461_v50, %v3460_v32  ;;  %v3462_v27 = vld [vmem:[%s6673_s1 + $0x3e0] sm:$0xff]  ;;  %v6170_v32 = vld [vmem:[%s5517_s7 + $0x150] sm:$0xff] }
  0xa4   : > { %4911 = vmatprep.subr.bf16.mxu0 %v4910_v45 }
  0xa5   : > { %4100 = vmatmul.mubr.f32.gmra.mrb[22].mxu1 %v6134_v31 }
  0xa6   : > { %4476 = vmatmul.mubr.f32.gmra.mrb[6].mxu0 %v6025_v1  ;;  %4102 = vmatprep.mubr.f32.mxu1 %v6138_v21  ;;  %v3463_v1 = vld [vmem:[%s6673_s1 + $0x3e8] sm:$0xff] }
  0xa7   : > { %4478 = vmatprep.mubr.f32.mxu0 %v6032_v51  ;;  %4913 = vmatpush3.bf16.msra.mxu0 %v4910_v45  ;;  %v6166_v51 = vld [vmem:[%s5517_s7 + $0x140] sm:$0xff]  ;;  %v4922_v50 = vpack.c.bf16 %v3463_v1, %v3462_v27  ;;  %v3464_v45 = vld [vmem:[%s6673_s1 + $0x3f0] sm:$0xff]  ;;  %v6186_v1 = vld [vmem:[%s5517_s7 + $0x168] sm:$0xff] }
  0xa8   : > { %4915 = vmatprep.subr.bf16.mxu0 %v4914_v52  ;;  %v3498_v27 = vld [vmem:[%s6673_s1 + $0x400] sm:$0xff] }
  0xa9   : > { %4103 = vmatmul.mubr.f32.gmra.mrb[24].mxu1 %v6150_v15 }
  0xaa   : > { %4479 = vmatmul.mubr.f32.gmra.mrb[8].mxu0 %v6047_v2  ;;  %4105 = vmatprep.mubr.f32.mxu1 %v6154_v59  ;;  %v3465_v2 = vld [vmem:[%s6673_s1 + $0x3f8] sm:$0xff] }
  0xab   : > { %4481 = vmatprep.mubr.f32.mxu0 %v6054_v56  ;;  %4917 = vmatpush3.bf16.msra.mxu0 %v4914_v52  ;;  %v6182_v56 = vld [vmem:[%s5517_s7 + $0x158] sm:$0xff]  ;;  %v4926_v52 = vpack.c.bf16 %v3465_v2, %v3464_v45  ;;  %v771_v2 = vld [vmem:[%s5517_s7 + $0x2] sm:$0xff]  ;;  %v3260_v45 = vld [vmem:[%s6673_s1 + $0x190] sm:$0xff] }
  0xac   : > { %4919 = vmatprep.subr.bf16.mxu0 %v4918_v16 }
  0xad   : > { %4106 = vmatmul.mubr.f32.gmra.mrb[26].mxu1 %v6166_v51 }
  0xae   : > { %4482 = vmatmul.mubr.f32.gmra.mrb[10].mxu0 %v6067_v63  ;;  %4108 = vmatprep.mubr.f32.mxu1 %v6170_v32  ;;  %v3499_v63 = vld [vmem:[%s6673_s1 + $0x408] sm:$0xff] }
  0xaf   : > { %4484 = vmatprep.mubr.f32.mxu0 %v6071_v47  ;;  %4921 = vmatpush3.bf16.msra.mxu0 %v4918_v16  ;;  %v6198_v47 = vld [vmem:[%s5517_s7 + $0x170] sm:$0xff]  ;;  %v6202_v16 = vpack.c.bf16 %v3499_v63, %v3498_v27  ;;  %v3262_v63 = vld [vmem:[%s6673_s1 + $0x1a0] sm:$0xff]  ;;  %v3263_v27 = vld [vmem:[%s6673_s1 + $0x1a8] sm:$0xff] }
  0xb0   : > { %4923 = vmatprep.subr.bf16.mxu0 %v4922_v50 }
  0xb1   : > { %4109 = vmatmul.mubr.f32.gmra.mrb[28].mxu1 %v6182_v56 }
  0xb2   : > { %4485 = vmatmul.mubr.f32.gmra.mrb[12].mxu0 %v6084_v23  ;;  %4111 = vmatprep.mubr.f32.mxu1 %v6186_v1  ;;  %v3261_v23 = vld [vmem:[%s6673_s1 + $0x198] sm:$0xff] }
  0xb3   : > { %4487 = vmatprep.mubr.f32.mxu0 %v6088_v17  ;;  %4925 = vmatpush3.bf16.msra.mxu0 %v4922_v50  ;;  %v4774_v50 = vpack.c.bf16 %v3261_v23, %v3260_v45  ;;  %v4778_v23 = vpack.c.bf16 %v3263_v27, %v3262_v63  ;;  %v3271_v45 = vld [vmem:[%s6673_s1 + $0x1e8] sm:$0xff]  ;;  %v3273_v63 = vld [vmem:[%s6673_s1 + $0x1f8] sm:$0xff] }
  0xb4   : > { %4927 = vmatprep.subr.bf16.mxu0 %v4926_v52  ;;  %v3400_v27 = vld [vmem:[%s5517_s7 + $0x198] sm:$0xff] }
  0xb5   : > { %4112 = vmatmul.mubr.f32.gmra.mrb[30].mxu1 %v6198_v47 }
  0xb6   : > { %4488 = vmatmul.mubr.f32.gmra.mrb[14].mxu0 %v6101_v39  ;;  %4146 = vmatprep.mubr.f32.mxu1 %v771_v2  ;;  %v3269_v2 = vld [vmem:[%s6673_s1 + $0x1d8] sm:$0xff] }
  0xb7   : > { %4490 = vmatprep.mubr.f32.mxu0 %v6106_v12  ;;  %4929 = vmatpush3.bf16.msra.mxu0 %v4926_v52  ;;  %v3265_v52 = vld [vmem:[%s6673_s1 + $0x1b8] sm:$0xff] }
  0xb8   : > { %4931 = vmatprep.subr.bf16.mxu0 %v6202_v16 }
  0xb9   : > { %4147 = vmatmul.mubr.f32.vlgmr.msra.gmra.mrb[0].mxu1 %v772_v42  ;;  %v3264_v42 = vld [vmem:[%s6673_s1 + $0x1b0] sm:$0xff] }
  0xba   : > { %4491 = vmatmul.mubr.f32.gmra.mrb[16].mxu0 %v6118_v8  ;;  %4773 = vmatpush3.bf16.msra.mxu1 %v6073_v29  ;;  %v3267_v29 = vld [vmem:[%s6673_s1 + $0x1c8] sm:$0xff] }
  0xbb   : > { %4149 = vmatprep.mubr.f32.mxu1 %v5730_v62  ;;  %4493 = vmatprep.mubr.f32.mxu0 %v6122_v36  ;;  %v4782_v62 = vpack.c.bf16 %v3265_v52, %v3264_v42  ;;  %v3500_v42 = vld [vmem:[%s6673_s1 + $0x410] sm:$0xff] }
  0xbc   : > { %4775 = vmatprep.subr.bf16.mxu1 %v4774_v50  ;;  %v3420_v52 = vld [vmem:[%s5517_s7 + $0x49] sm:$0xff] }
  0xbd   : > { %4150 = vmatmul.mubr.f32.gmra.mrb[2].mxu1 %v5744_v3  ;;  %v3266_v3 = vld [vmem:[%s6673_s1 + $0x1c0] sm:$0xff] }
  0xbe   : > { %4494 = vmatmul.mubr.f32.gmra.mrb[18].mxu0 %v6134_v31  ;;  %4152 = vmatprep.mubr.f32.mxu1 %v5750_v5  ;;  %v4786_v5 = vpack.c.bf16 %v3267_v29, %v3266_v3  ;;  %v3503_v3 = vld [vmem:[%s6673_s1 + $0x428] sm:$0xff] }
  0xbf   : > { %4496 = vmatprep.mubr.f32.mxu0 %v6138_v21  ;;  %4777 = vmatpush3.bf16.msra.mxu1 %v4774_v50  ;;  %v3272_v50 = vld [vmem:[%s6673_s1 + $0x1f0] sm:$0xff]  ;;  %v3422_v29 = vld [vmem:[%s5517_s7 + $0x61] sm:$0xff] }
  0xc0   : > { %4779 = vmatprep.subr.bf16.mxu1 %v4778_v23 }
  0xc1   : > { %4153 = vmatmul.mubr.f32.gmra.mrb[4].mxu1 %v5767_v11  ;;  %v3268_v11 = vld [vmem:[%s6673_s1 + $0x1d0] sm:$0xff] }
  0xc2   : > { %4497 = vmatmul.mubr.f32.gmra.mrb[20].mxu0 %v6150_v15  ;;  %4155 = vmatprep.mubr.f32.mxu1 %v5773_v14  ;;  %v4790_v14 = vpack.c.bf16 %v3269_v2, %v3268_v11  ;;  %v3505_v11 = vld [vmem:[%s6673_s1 + $0x438] sm:$0xff] }
  0xc3   : > { %4499 = vmatprep.mubr.f32.mxu0 %v6154_v59  ;;  %4781 = vmatpush3.bf16.msra.mxu1 %v4778_v23  ;;  %v3401_v23 = vld [vmem:[%s5517_s7 + $0x1a0] sm:$0xff] }
  0xc4   : > { %4783 = vmatprep.subr.bf16.mxu1 %v4782_v62 }
  0xc5   : > { %4156 = vmatmul.mubr.f32.gmra.mrb[6].mxu1 %v5789_v20  ;;  %v3270_v20 = vld [vmem:[%s6673_s1 + $0x1e0] sm:$0xff] }
  0xc6   : > { %4500 = vmatmul.mubr.f32.gmra.mrb[22].mxu0 %v6166_v51  ;;  %4158 = vmatprep.mubr.f32.mxu1 %v5795_v22  ;;  %v6266_v22 = vld [vmem:[%s5517_s7 + $0x180] sm:$0xff] }
  0xc7   : > { %4502 = vmatprep.mubr.f32.mxu0 %v6170_v32  ;;  %4785 = vmatpush3.bf16.msra.mxu1 %v4782_v62 }
  0xc8   : > { %4787 = vmatprep.subr.bf16.mxu1 %v4786_v5 }
  0xc9   : > { %4159 = vmatmul.mubr.f32.gmra.mrb[8].mxu1 %v5811_v28  ;;  %v4794_v28 = vpack.c.bf16 %v3271_v45, %v3270_v20  ;;  %v3509_v45 = vld [vmem:[%s6673_s1 + $0x458] sm:$0xff] }
  0xca   : > { %4503 = vmatmul.mubr.f32.gmra.mrb[24].mxu0 %v6182_v56  ;;  %4161 = vmatprep.mubr.f32.mxu1 %v5817_v30  ;;  %v6279_v30 = vld [vmem:[%s5517_s7 + $0x188] sm:$0xff] }
  0xcb   : > { %4505 = vmatprep.mubr.f32.mxu0 %v6186_v1  ;;  %4789 = vmatpush3.bf16.msra.mxu1 %v4786_v5  ;;  %v3504_v5 = vld [vmem:[%s6673_s1 + $0x430] sm:$0xff] }
  0xcc   : > { %4791 = vmatprep.subr.bf16.mxu1 %v4790_v14  ;;  %v4942_v2 = vpack.c.bf16 %v3505_v11, %v3504_v5  ;;  %v6403_v5 = vld [vmem:[%s5517_s7 + $0x189] sm:$0xff]  ;;  %v3448_v11 = vld [vmem:[%s5517_s7 + $0x199] sm:$0xff] }
  0xcd   : > { %4162 = vmatmul.mubr.f32.gmra.mrb[10].mxu1 %v5833_v38  ;;  %v4798_v38 = vpack.c.bf16 %v3273_v63, %v3272_v50  ;;  %v3511_v63 = vld [vmem:[%s6673_s1 + $0x468] sm:$0xff] }
  0xce   : > { %4506 = vmatmul.mubr.f32.gmra.mrb[26].mxu0 %v6198_v47  ;;  %4164 = vmatprep.mubr.f32.mxu1 %v5839_v40  ;;  %v3418_v40 = vld [vmem:[%s5517_s7 + $0x31] sm:$0xff] }
  0xcf   : > { %4508 = vmatprep.mubr.f32.mxu0 %v6266_v22  ;;  %4793 = vmatpush3.bf16.msra.mxu1 %v4790_v14  ;;  %v3507_v14 = vld [vmem:[%s6673_s1 + $0x448] sm:$0xff] }
  0xd0   : > { %4795 = vmatprep.subr.bf16.mxu1 %v4794_v28 }
  0xd1   : > { %4165 = vmatmul.mubr.f32.gmra.mrb[12].mxu1 %v5855_v46  ;;  %v3501_v46 = vld [vmem:[%s6673_s1 + $0x418] sm:$0xff] }
  0xd2   : > { %4509 = vmatmul.mubr.f32.gmra.mrb[28].mxu0 %v6279_v30  ;;  %4167 = vmatprep.mubr.f32.mxu1 %v5861_v48  ;;  %v3419_v48 = vld [vmem:[%s5517_s7 + $0x39] sm:$0xff]  ;;  %v4934_v62 = vpack.c.bf16 %v3501_v46, %v3500_v42 }
  0xd3   : > { %4511 = vmatprep.mubr.f32.mxu0 %v3400_v27  ;;  %4797 = vmatpush3.bf16.msra.mxu1 %v4794_v28  ;;  %v3428_v28 = vld [vmem:[%s5517_s7 + $0xa9] sm:$0xff]  ;;  %v3513_v27 = vld [vmem:[%s6673_s1 + $0x478] sm:$0xff]  ;;  %v6766_v46 = vld [vmem:[#allocation29_spill] sm:$0xff] }
  0xd4   : > { %4799 = vmatprep.subr.bf16.mxu1 %v4798_v38  ;;  %v6765_v42 = vld [vmem:[#allocation8_spill] sm:$0xff] }
  0xd5   : > { %4168 = vmatmul.mubr.f32.gmra.mrb[14].mxu1 %v5877_v55  ;;  %v3502_v55 = vld [vmem:[%s6673_s1 + $0x420] sm:$0xff] }
  0xd6   : > { %4512 = vmatmul.mubr.f32.gmra.mrb[30].mxu0 %v3401_v23  ;;  %4170 = vmatprep.mubr.f32.mxu1 %v5883_v57  ;;  %v3421_v57 = vld [vmem:[%s5517_s7 + $0x51] sm:$0xff] }
  0xd7   : > { %4546 = vmatprep.mubr.f32.mxu0 %v3418_v40  ;;  %4801 = vmatpush3.bf16.msra.mxu1 %v4798_v38  ;;  %v6762_v38 = vld [vmem:[#allocation17_spill] sm:$0xff]  ;;  %v6763_v23 = vld [vmem:[#allocation28_spill] sm:$0xff]  ;;  %v6764_v40 = vld [vmem:[#allocation18_spill] sm:$0xff] }
  0xd8   : > { %4962 = vmatprep.subr.bf16.mxu1 %v5474_v7 }
  0xd9   : > { %4171 = vmatmul.mubr.f32.gmra.mrb[16].mxu1 %v5899_v0  ;;  %v4938_v0 = vpack.c.bf16 %v3503_v3, %v3502_v55  ;;  %v6395_v55 = vld [vmem:[%s5517_s7 + $0x181] sm:$0xff] }
  0xda   : > { %4547 = vmatmul.mubr.f32.vlgmr.msra.gmra.mrb[0].mxu0 %v3419_v48  ;;  %4173 = vmatprep.mubr.f32.mxu1 %v5903_v6  ;;  %v3423_v6 = vld [vmem:[%s5517_s7 + $0x69] sm:$0xff]  ;;  %v6770_v3 = vld [vmem:[#allocation9_spill] sm:$0xff] }
  0xdb   : > { %4933 = vmatpush3.bf16.msra.mxu0 %v6202_v16  ;;  %4549 = vmatprep.mubr.f32.mxu0 %v3420_v52  ;;  %v3424_v16 = vld [vmem:[%s5517_s7 + $0x79] sm:$0xff]  ;;  %v6767_v48 = vld [vmem:[#allocation19_spill] sm:$0xff]  ;;  %v6768_v52 = vld [vmem:[#allocation30_spill] sm:$0xff] }
  0xdc   : > { %4935 = vmatprep.subr.bf16.mxu0 %v4934_v62 }
  0xdd   : > { %4174 = vmatmul.mubr.f32.gmra.mrb[18].mxu1 %v5918_v18  ;;  %v3506_v18 = vld [vmem:[%s6673_s1 + $0x440] sm:$0xff] }
  0xde   : > { %4550 = vmatmul.mubr.f32.gmra.mrb[2].mxu0 %v3421_v57  ;;  %4176 = vmatprep.mubr.f32.mxu1 %v5924_v25  ;;  %v3425_v25 = vld [vmem:[%s5517_s7 + $0x81] sm:$0xff]  ;;  %v4946_v20 = vpack.c.bf16 %v3507_v14, %v3506_v18  ;;  %v6771_v57 = vld [vmem:[#allocation31_spill] sm:$0xff] }
  0xdf   : > { %4552 = vmatprep.mubr.f32.mxu0 %v3422_v29  ;;  %4937 = vmatpush3.bf16.msra.mxu0 %v4934_v62  ;;  %v6769_v62 = vld [vmem:[#allocation20_spill] sm:$0xff]  ;;  %v6772_v29 = vld [vmem:[#allocation21_spill] sm:$0xff] }
  0xe0   : > { %4939 = vmatprep.subr.bf16.mxu0 %v4938_v0  ;;  %v3449_v18 = vld [vmem:[%s5517_s7 + $0x1a1] sm:$0xff]  ;;  %v3466_v14 = vld [vmem:[%s5517_s7 + $0x32] sm:$0xff] }
  0xe1   : > { %4177 = vmatmul.mubr.f32.gmra.mrb[20].mxu1 %v5941_v41  ;;  %v3508_v41 = vld [vmem:[%s6673_s1 + $0x450] sm:$0xff] }
  0xe2   : > { %4553 = vmatmul.mubr.f32.gmra.mrb[4].mxu0 %v3423_v6  ;;  %4179 = vmatprep.mubr.f32.mxu1 %v5947_v44  ;;  %v3427_v44 = vld [vmem:[%s5517_s7 + $0x99] sm:$0xff]  ;;  %v4950_v50 = vpack.c.bf16 %v3509_v45, %v3508_v41  ;;  %v6774_v6 = vld [vmem:[#allocation10_spill] sm:$0xff] }
  0xe3   : > { %4555 = vmatprep.mubr.f32.mxu0 %v3424_v16  ;;  %4941 = vmatpush3.bf16.msra.mxu0 %v4938_v0  ;;  %v6773_v0 = vld [vmem:[#allocation32_spill] sm:$0xff]  ;;  %v6775_v16 = vld [vmem:[#allocation33_spill] sm:$0xff]  ;;  %v3468_v45 = vld [vmem:[%s5517_s7 + $0x4a] sm:$0xff] }
  0xe4   : > { %4943 = vmatprep.subr.bf16.mxu0 %v4942_v2  ;;  %v3467_v41 = vld [vmem:[%s5517_s7 + $0x3a] sm:$0xff] }
  0xe5   : > { %4180 = vmatmul.mubr.f32.gmra.mrb[22].mxu1 %v5963_v58  ;;  %v3510_v58 = vld [vmem:[%s6673_s1 + $0x460] sm:$0xff] }
  0xe6   : > { %4556 = vmatmul.mubr.f32.gmra.mrb[6].mxu0 %v3425_v25  ;;  %4182 = vmatprep.mubr.f32.mxu1 %v5969_v60  ;;  %v4954_v60 = vpack.c.bf16 %v3511_v63, %v3510_v58  ;;  %v6777_v25 = vld [vmem:[#allocation11_spill] sm:$0xff]  ;;  %v3483_v58 = vld [vmem:[%s5517_s7 + $0xfa] sm:$0xff] }
  0xe7   : > { %4558 = vmatprep.mubr.f32.mxu0 %v5679_v35  ;;  %4945 = vmatpush3.bf16.msra.mxu0 %v4942_v2  ;;  %v3429_v35 = vld [vmem:[%s5517_s7 + $0xb1] sm:$0xff]  ;;  %v6776_v2 = vld [vmem:[#allocation34_spill] sm:$0xff]  ;;  %v3293_v63 = vld [vmem:[%s5517_s7 + $0xf9] sm:$0xff] }
  0xe8   : > { %4947 = vmatprep.subr.bf16.mxu0 %v4946_v20 }
  0xe9   : > { %4183 = vmatmul.mubr.f32.gmra.mrb[24].mxu1 %v5985_v26  ;;  %v3512_v26 = vld [vmem:[%s6673_s1 + $0x470] sm:$0xff] }
  0xea   : > { %4559 = vmatmul.mubr.f32.gmra.mrb[8].mxu0 %v3427_v44  ;;  %4185 = vmatprep.mubr.f32.mxu1 %v5991_v33  ;;  %v4958_v33 = vpack.c.bf16 %v3513_v27, %v3512_v26  ;;  %v3469_v44 = vld [vmem:[%s5517_s7 + $0x52] sm:$0xff]  ;;  %v3487_v27 = vld [vmem:[%s5517_s7 + $0x12a] sm:$0xff] }
  0xeb   : > { %4561 = vmatprep.mubr.f32.mxu0 %v3428_v28  ;;  %4949 = vmatpush3.bf16.msra.mxu0 %v4946_v20  ;;  %v6778_v20 = vld [vmem:[#allocation35_spill] sm:$0xff]  ;;  %v3470_v28 = vld [vmem:[%s5517_s7 + $0x62] sm:$0xff] }
  0xec   : > { %4951 = vmatprep.subr.bf16.mxu0 %v4950_v50  ;;  %v3295_v26 = vld [vmem:[%s5517_s7 + $0x111] sm:$0xff] }
  0xed   : > { %4186 = vmatmul.mubr.f32.gmra.mrb[26].mxu1 %v6007_v9  ;;  %v6759_v9 = vld [vmem:[#allocation16_spill] sm:$0xff] }
  0xee   : > { %4562 = vmatmul.mubr.f32.gmra.mrb[10].mxu0 %v3429_v35  ;;  %4188 = vmatprep.mubr.f32.mxu1 %v6013_v43  ;;  %v6748_v43 = vld [vmem:[#allocation22_spill] sm:$0xff]  ;;  %v3485_v35 = vld [vmem:[%s5517_s7 + $0x112] sm:$0xff] }
  0xef   : > { %4564 = vmatprep.mubr.f32.mxu0 %v5711_v54  ;;  %4953 = vmatpush3.bf16.msra.mxu0 %v4950_v50  ;;  %v6749_v54 = vld [vmem:[#allocation12_spill] sm:$0xff] }
  0xf0   : > { %4955 = vmatprep.subr.bf16.mxu0 %v4954_v60  ;;  %v3472_v50 = vld [vmem:[%s5517_s7 + $0x7a] sm:$0xff] }
  0xf1   : > { %4189 = vmatmul.mubr.f32.gmra.mrb[28].mxu1 %v6029_v49  ;;  %v6760_v49 = vld [vmem:[#allocation7_spill] sm:$0xff] }
  0xf2   : > { %4565 = vmatmul.mubr.f32.gmra.mrb[12].mxu0 %v5727_v61  ;;  %4191 = vmatprep.mubr.f32.mxu1 %v6035_v53  ;;  %v6750_v61 = vld [vmem:[#allocation5_spill] sm:$0xff]  ;;  %v6753_v53 = vld [vmem:[#allocation24_spill] sm:$0xff] }
  0xf3   : > { %4567 = vmatprep.mubr.f32.mxu0 %v5747_v4  ;;  %4957 = vmatpush3.bf16.msra.mxu0 %v4954_v60  ;;  %v6751_v4 = vld [vmem:[#allocation23_spill] sm:$0xff]  ;;  %v3486_v60 = vld [vmem:[%s5517_s7 + $0x122] sm:$0xff] }
  0xf4   : > { %4959 = vmatprep.subr.bf16.mxu0 %v4958_v33 }
  0xf5   : > { %4192 = vmatmul.mubr.f32.gmra.mrb[30].mxu1 %v6051_v37  ;;  %v6761_v37 = vld [vmem:[#allocation27_spill] sm:$0xff] }
  0xf6   : > { %4568 = vmatmul.mubr.f32.gmra.mrb[14].mxu0 %v5763_v10  ;;  %4226 = vmatprep.mubr.f32.mxu1 %v5921_v24  ;;  %v6752_v10 = vld [vmem:[#allocation13_spill] sm:$0xff]  ;;  %v6755_v24 = vld [vmem:[#allocation6_spill] sm:$0xff] }
  0xf7   : > { %4570 = vmatprep.mubr.f32.mxu0 %v5770_v13  ;;  %4961 = vmatpush3.bf16.msra.mxu0 %v4958_v33  ;;  %v6754_v13 = vld [vmem:[#allocation14_spill] sm:$0xff] }
  0xf8   : > { %v3296_v33 = vld [vmem:[%s5517_s7 + $0x121] sm:$0xff] }
  0xf9   : > { %4227 = vmatmul.mubr.f32.vlgmr.msra.gmra.mrb[0].mxu1 %v5936_v34  ;;  %v6758_v34 = vld [vmem:[#allocation26_spill] sm:$0xff] }
  0xfa   : > { %4571 = vmatmul.mubr.f32.gmra.mrb[16].mxu0 %v5785_v19  ;;  %4970 = vmatpush3.bf16.msra.mxu1 %v5474_v7  ;;  %v6756_v19 = vld [vmem:[#allocation25_spill] sm:$0xff]  ;;  %v6757_v7 = vld [vmem:[#allocation15_spill] sm:$0xff] }
  0xfb   : > { %4229 = vmatprep.mubr.f32.mxu1 %v6748_v43  ;;  %4573 = vmatprep.mubr.f32.mxu0 %v6749_v54  ;;  %v3488_v43 = vld [vmem:[%s5517_s7 + $0x13a] sm:$0xff]  ;;  %v3297_v54 = vld [vmem:[%s5517_s7 + $0x129] sm:$0xff] }
  0xfc   : > { %4963 = vmatprep.subr.bf16.mxu1 %v6750_v61 }
  0xfd   : > { %4230 = vmatmul.mubr.f32.gmra.mrb[2].mxu1 %v6751_v4  ;;  %v3298_v4 = vld [vmem:[%s5517_s7 + $0x139] sm:$0xff] }
  0xfe   : > { %4574 = vmatmul.mubr.f32.gmra.mrb[18].mxu0 %v6752_v10  ;;  %4232 = vmatprep.mubr.f32.mxu1 %v6753_v53  ;;  %v3490_v10 = vld [vmem:[%s5517_s7 + $0x152] sm:$0xff]  ;;  %v3299_v53 = vld [vmem:[%s5517_s7 + $0x141] sm:$0xff] }
  0xff   : > { %4576 = vmatprep.mubr.f32.mxu0 %v6754_v13  ;;  %4971 = vmatpush3.bf16.msra.mxu1 %v6750_v61  ;;  %v3489_v61 = vld [vmem:[%s5517_s7 + $0x142] sm:$0xff]  ;;  %v3491_v13 = vld [vmem:[%s5517_s7 + $0x15a] sm:$0xff] }
 0x100   : > { %4964 = vmatprep.subr.bf16.mxu1 %v6755_v24 }
 0x101   : > { %4233 = vmatmul.mubr.f32.gmra.mrb[4].mxu1 %v6756_v19  ;;  %v3492_v19 = vld [vmem:[%s5517_s7 + $0x16a] sm:$0xff] }
 0x102   : > { %4577 = vmatmul.mubr.f32.gmra.mrb[20].mxu0 %v6757_v7  ;;  %4235 = vmatprep.mubr.f32.mxu1 %v6758_v34  ;;  %v3301_v7 = vld [vmem:[%s5517_s7 + $0x159] sm:$0xff] }
 0x103   : > { %4579 = vmatprep.mubr.f32.mxu0 %v6759_v9  ;;  %4972 = vmatpush3.bf16.msra.mxu1 %v6755_v24  ;;  %v3300_v24 = vld [vmem:[%s5517_s7 + $0x151] sm:$0xff]  ;;  %v3302_v9 = vld [vmem:[%s5517_s7 + $0x169] sm:$0xff] }
 0x104   : > { %4965 = vmatprep.subr.bf16.mxu1 %v6760_v49  ;;  %v3493_v34 = vld [vmem:[%s5517_s7 + $0x172] sm:$0xff] }
 0x105   : > { %4236 = vmatmul.mubr.f32.gmra.mrb[6].mxu1 %v6761_v37  ;;  %v3303_v37 = vld [vmem:[%s5517_s7 + $0x171] sm:$0xff] }
 0x106   : > { %4580 = vmatmul.mubr.f32.gmra.mrb[22].mxu0 %v6762_v38  ;;  %4238 = vmatprep.mubr.f32.mxu1 %v6763_v23  ;;  %v3495_v38 = vld [vmem:[%s5517_s7 + $0x18a] sm:$0xff]  ;;  %v3496_v23 = vld [vmem:[%s5517_s7 + $0x19a] sm:$0xff] }
 0x107   : > { %4582 = vmatprep.mubr.f32.mxu0 %v6764_v40  ;;  %4973 = vmatpush3.bf16.msra.mxu1 %v6760_v49  ;;  %v3494_v49 = vld [vmem:[%s5517_s7 + $0x182] sm:$0xff] }
 0x108   : > { %4966 = vmatprep.subr.bf16.mxu1 %v6765_v42  ;;  %v3497_v40 = vld [vmem:[%s5517_s7 + $0x1a2] sm:$0xff] }
 0x109   : > { %4239 = vmatmul.mubr.f32.gmra.mrb[8].mxu1 %v6766_v46 }
 0x10a   : > { %4583 = vmatmul.mubr.f32.gmra.mrb[24].mxu0 %v6767_v48  ;;  %4241 = vmatprep.mubr.f32.mxu1 %v6768_v52 }
 0x10b   : > { %4585 = vmatprep.mubr.f32.mxu0 %v6769_v62  ;;  %4974 = vmatpush3.bf16.msra.mxu1 %v6765_v42 }
 0x10c   : > { %4967 = vmatprep.subr.bf16.mxu1 %v6770_v3 }
 0x10d   : > { %4242 = vmatmul.mubr.f32.gmra.mrb[10].mxu1 %v6771_v57 }
 0x10e   : > { %4586 = vmatmul.mubr.f32.gmra.mrb[26].mxu0 %v6772_v29  ;;  %4244 = vmatprep.mubr.f32.mxu1 %v6773_v0 }
 0x10f   : > { %4588 = vmatprep.mubr.f32.mxu0 %v6395_v55  ;;  %4975 = vmatpush3.bf16.msra.mxu1 %v6770_v3 }
 0x110   : > { %4968 = vmatprep.subr.bf16.mxu1 %v6774_v6 }
 0x111   : > { %4245 = vmatmul.mubr.f32.gmra.mrb[12].mxu1 %v6775_v16 }
 0x112   : > { %4589 = vmatmul.mubr.f32.gmra.mrb[28].mxu0 %v6403_v5  ;;  %4247 = vmatprep.mubr.f32.mxu1 %v6776_v2 }
 0x113   : > { %4591 = vmatprep.mubr.f32.mxu0 %v3448_v11  ;;  %4976 = vmatpush3.bf16.msra.mxu1 %v6774_v6 }
 0x114   : > { %4969 = vmatprep.subr.bf16.mxu1 %v6777_v25 }
 0x115   : > { %4248 = vmatmul.mubr.f32.gmra.mrb[14].mxu1 %v6778_v20 }
 0x116   : > { %4592 = vmatmul.mubr.f32.gmra.mrb[30].mxu0 %v3449_v18  ;;  %4250 = vmatprep.mubr.f32.mxu1 %v6088_v17  ;;  %v3471_v17 = vld [vmem:[%s5517_s7 + $0x6a] sm:$0xff] }
 0x117   : > { %4626 = vmatprep.mubr.f32.mxu0 %v3466_v14  ;;  %4977 = vmatpush3.bf16.msra.mxu1 %v6777_v25  ;;  %v6500_v25 = vld [vmem:[%s6674_s2] ss:$0 sm:$0xff] }
 0x119   : > { %4251 = vmatmul.mubr.f32.gmra.mrb[16].mxu1 %v6101_v39  ;;  %v3473_v39 = vld [vmem:[%s5517_s7 + $0x82] sm:$0xff] }
 0x11a   : > { %4627 = vmatmul.mubr.f32.vlgmr.msra.gmra.mrb[0].mxu0 %v3467_v41  ;;  %4253 = vmatprep.mubr.f32.mxu1 %v6106_v12  ;;  %v3474_v12 = vld [vmem:[%s5517_s7 + $0x92] sm:$0xff] }
 0x11b   : > { %4629 = vmatprep.mubr.f32.mxu0 %v3468_v45  ;;  %v6507_v45 = vld [vmem:[%s6675_s3] ss:$0 sm:$0xff] }
 0x11d   : > { %4254 = vmatmul.mubr.f32.gmra.mrb[18].mxu1 %v6118_v8  ;;  %v3475_v8 = vld [vmem:[%s5517_s7 + $0x9a] sm:$0xff] }
 0x11e   : > { %4630 = vmatmul.mubr.f32.gmra.mrb[2].mxu0 %v3469_v44  ;;  %4256 = vmatprep.mubr.f32.mxu1 %v6122_v36  ;;  %v3476_v36 = vld [vmem:[%s5517_s7 + $0xaa] sm:$0xff] }
 0x11f   : > { %4632 = vmatprep.mubr.f32.mxu0 %v3470_v28 }
 0x121   : > { %4257 = vmatmul.mubr.f32.gmra.mrb[20].mxu1 %v6134_v31  ;;  %v3477_v31 = vld [vmem:[%s5517_s7 + $0xb2] sm:$0xff] }
 0x122   : > { %4633 = vmatmul.mubr.f32.gmra.mrb[4].mxu0 %v3471_v17  ;;  %4259 = vmatprep.mubr.f32.mxu1 %v6138_v21  ;;  %v3478_v21 = vld [vmem:[%s5517_s7 + $0xc2] sm:$0xff] }
 0x123   : > { %4635 = vmatprep.mubr.f32.mxu0 %v3472_v50 }
 0x125   : > { %4260 = vmatmul.mubr.f32.gmra.mrb[22].mxu1 %v6150_v15  ;;  %v3479_v15 = vld [vmem:[%s5517_s7 + $0xca] sm:$0xff] }
 0x126   : > { %4636 = vmatmul.mubr.f32.gmra.mrb[6].mxu0 %v3473_v39  ;;  %4262 = vmatprep.mubr.f32.mxu1 %v6154_v59  ;;  %v3481_v59 = vld [vmem:[%s5517_s7 + $0xe2] sm:$0xff] }
 0x127   : > { %4638 = vmatprep.mubr.f32.mxu0 %v3474_v12 }
 0x129   : > { %4263 = vmatmul.mubr.f32.gmra.mrb[24].mxu1 %v6166_v51  ;;  %v3480_v51 = vld [vmem:[%s5517_s7 + $0xda] sm:$0xff] }
 0x12a   : > { %4639 = vmatmul.mubr.f32.gmra.mrb[8].mxu0 %v3475_v8  ;;  %4265 = vmatprep.mubr.f32.mxu1 %v6170_v32  ;;  %v3482_v32 = vld [vmem:[%s5517_s7 + $0xf2] sm:$0xff] }
 0x12b   : > { %4641 = vmatprep.mubr.f32.mxu0 %v3476_v36 }
 0x12d   : > { %4266 = vmatmul.mubr.f32.gmra.mrb[26].mxu1 %v6182_v56  ;;  %v3290_v56 = vld [vmem:[%s5517_s7 + $0xd9] sm:$0xff] }
 0x12e   : > { %4642 = vmatmul.mubr.f32.gmra.mrb[10].mxu0 %v3477_v31  ;;  %4268 = vmatprep.mubr.f32.mxu1 %v6186_v1  ;;  %v3291_v1 = vld [vmem:[%s5517_s7 + $0xe1] sm:$0xff] }
 0x12f   : > { %4644 = vmatprep.mubr.f32.mxu0 %v3478_v21 }
 0x131   : > { %4269 = vmatmul.mubr.f32.gmra.mrb[28].mxu1 %v6198_v47  ;;  %v3292_v47 = vld [vmem:[%s5517_s7 + $0xf1] sm:$0xff] }
 0x132   : > { %4645 = vmatmul.mubr.f32.gmra.mrb[12].mxu0 %v3479_v15  ;;  %4271 = vmatprep.mubr.f32.mxu1 %v6266_v22  ;;  %v3484_v22 = vld [vmem:[%s5517_s7 + $0x10a] sm:$0xff] }
 0x133   : > { %4647 = vmatprep.mubr.f32.mxu0 %v3480_v51 }
 0x135   : > { %4272 = vmatmul.mubr.f32.gmra.mrb[30].mxu1 %v6279_v30  ;;  %v3294_v30 = vld [vmem:[%s5517_s7 + $0x109] sm:$0xff]  ;;  %s212_s7 = sand.u32 1, %s5354_s16  }
 0x136   : > { %4648 = vmatmul.mubr.f32.gmra.mrb[14].mxu0 %v3481_v59  ;;  %4330 = vmatprep.mubr.f32.mxu1 %v3290_v56  ;;  %s3192_s11 = sshll.u32 %s212_s7, 8  ;;  %s6626_s18 = scalar_lea.sflag [#allocation3], %s212_s7 }
 0x137   : > { %4650 = vmatprep.mubr.f32.mxu0 %v3482_v32  ;;  %s6514_s14 = scalar_lea.vmem [#allocation2], %s3192_s11 }
 0x138   : > { %s3105_s22 = sshll.u32 %s6514_s14, 4  ;;  %s6620_s22 = int_to_ptr.vmem [resolvable:$true] %s3105_s22 }
 0x139   : > { %4331 = vmatmul.mubr.f32.vlgmr.msra.gmra.mrb[16].mxu1 %v3291_v1  ;;  %s5292_s30 = scalar_lea.vmem %s6620_s22, 4096  ;;  %p5299_p1 = scmp.lt.s32.totalorder %s6620_s22, %s5297_s6 }
 0x13a   : > { %4651 = vmatmul.mubr.f32.gmra.mrb[16].mxu0 %v3483_v58  ;;  %4333 = vmatprep.mubr.f32.mxu1 %v3292_v47  ;;  %p5293_p12 = scmp.ne.s32.totalorder %s6620_s22, %s5292_s30  ;;  %p5300_p2 = scmp.lt.s32.totalorder %s5298_s8, %s5292_s30 }
 0x13b   : > { %4653 = vmatprep.mubr.f32.mxu0 %v3484_v22 }
 0x13c   : > { %p5294_p13 = pnand %p5293_p12, %p5440_p4  ;;  %p5301_p3 = por %p5300_p2, %p5299_p1 }
 0x13d   : > { %4334 = vmatmul.mubr.f32.gmra.mrb[18].mxu1 %v3293_v63 }
 0x13e   : > { %4654 = vmatmul.mubr.f32.gmra.mrb[18].mxu0 %v3485_v35  ;;  %4336 = vmatprep.mubr.f32.mxu1 %v3294_v30  ;;  %p5295_p0 = pneg %p5294_p13 }
 0x13f   : > { %4656 = vmatprep.mubr.f32.mxu0 %v3486_v60 }
 0x140   : > { %p5302_p5 = pnand %p5301_p3, %p5295_p0 }
 0x141   : > { %4337 = vmatmul.mubr.f32.gmra.mrb[20].mxu1 %v3295_v26 }
 0x142   : > { %4657 = vmatmul.mubr.f32.gmra.mrb[20].mxu0 %v3487_v27  ;;  %4339 = vmatprep.mubr.f32.mxu1 %v3296_v33 }
 0x143   : > { %4659 = vmatprep.mubr.f32.mxu0 %v3488_v43 }
 0x145   : > { %4340 = vmatmul.mubr.f32.gmra.mrb[22].mxu1 %v3297_v54 }
 0x146   : > { %4660 = vmatmul.mubr.f32.gmra.mrb[22].mxu0 %v3489_v61  ;;  %4342 = vmatprep.mubr.f32.mxu1 %v3298_v4 }
 0x147   : > { %4662 = vmatprep.mubr.f32.mxu0 %v3490_v10 }
 0x149   : > { %4343 = vmatmul.mubr.f32.gmra.mrb[24].mxu1 %v3299_v53 }
 0x14a   : > { %4663 = vmatmul.mubr.f32.gmra.mrb[24].mxu0 %v3491_v13  ;;  %4345 = vmatprep.mubr.f32.mxu1 %v3300_v24 }
 0x14b   : > { %4665 = vmatprep.mubr.f32.mxu0 %v3492_v19 }
 0x14d   : > { %4346 = vmatmul.mubr.f32.gmra.mrb[26].mxu1 %v3301_v7 }
 0x14e   : > { %4666 = vmatmul.mubr.f32.gmra.mrb[26].mxu0 %v3493_v34  ;;  %4348 = vmatprep.mubr.f32.mxu1 %v3302_v9 }
 0x14f   : > { %4668 = vmatprep.mubr.f32.mxu0 %v3494_v49 }
 0x151   : > { %4349 = vmatmul.mubr.f32.gmra.mrb[28].mxu1 %v3303_v37 }
 0x152   : > { %4669 = vmatmul.mubr.f32.gmra.mrb[28].mxu0 %v3495_v38  ;;  %4351 = vmatprep.mubr.f32.mxu1 %v6395_v55 }
 0x153   : > { %4671 = vmatprep.mubr.f32.mxu0 %v3496_v23 }
 0x155   : > { %4352 = vmatmul.mubr.f32.gmra.mrb[30].mxu1 %v6403_v5 }
 0x156   : > { %4672 = vmatmul.mubr.f32.gmra.mrb[30].mxu0 %v3497_v40 }
 0x1cc   : > { %v4228_v42 = vpop.f32.mrb[0].mxu1 }
 0x1cd   : > { %v1193_v46 = vpop.f32.mrb[1].mxu1 }
 0x1d0   : > { %v4231_v48 = vpop.f32.mrb[2].mxu1 }
 0x1d1   : > { %v1203_v52 = vpop.f32.mrb[3].mxu1 }
 0x1d4   : > { %v4234_v62 = vpop.f32.mrb[4].mxu1 }
 0x1d5   : > { %v1213_v3 = vpop.f32.mrb[5].mxu1 }
 0x1d8   : > { %v4237_v57 = vpop.f32.mrb[6].mxu1 }
 0x1d9   : > { %v1223_v29 = vpop.f32.mrb[7].mxu1 }
 0x1dc   : > { %v6480_v0 = vpop.f32.mrb[8].mxu1 }
 0x1dd   : > { %v6482_v11 = vpop.f32.mrb[9].mxu1 }
 0x1e0   : > { %v6484_v55 = vpop.f32.mrb[10].mxu1 }
 0x1e1   : > { %v6486_v6 = vpop.f32.mrb[11].mxu1 }
 0x1e4   : > { %v6488_v5 = vpop.f32.mrb[12].mxu1 }
 0x1e5   : > { %v6490_v16 = vpop.f32.mrb[13].mxu1 }
 0x1e8   : > { %v6492_v2 = vpop.f32.mrb[14].mxu1 }
 0x1e9   : > { %v6494_v18 = vpop.f32.mrb[15].mxu1 }
 0x1ed   : > { %v4628_v14 = vpop.f32.mrb[0].mxu0 }
 0x1ee   : > { %v4978_v20 = vadd.f32 %v4628_v14, %v4228_v42  ;;  %v2724_v41 = vpop.f32.mrb[1].mxu0 }
 0x1ef   : > { %v4979_v44 = vadd.f32 %v2724_v41, %v1193_v46 }
 0x1f0   : > { %v2923_v28 = vadd.f32 %v4978_v20, %v6500_v25 }
 0x1f1   : > { %v2922_v17 = vadd.f32 %v4979_v44, %v6500_v25  ;;  %v4631_v50 = vpop.f32.mrb[2].mxu0 }
 0x1f2   : > { %vm2955_vm0 = vcmp.ge.f32.partialorder %v2923_v28, 0.0  ;;  %v2994_v39 = vmul.f32 %v6507_v45, %v2923_v28  ;;  %v4980_v12 = vadd.f32 %v4631_v50, %v4231_v48  ;;  %v2734_v8 = vpop.f32.mrb[3].mxu0 }
 0x1f3   : > { %vm2954_vm1 = vcmp.ge.f32.partialorder %v2922_v17, 0.0  ;;  %v2993_v36 = vmul.f32 %v6507_v45, %v2922_v17  ;;  %v4981_v31 = vadd.f32 %v2734_v8, %v1203_v52 }
 0x1f4   : > { %v3026_v21 = vsel %vm2955_vm0, %v2923_v28, %v2994_v39  ;;  %v2925_v15 = vadd.f32 %v4980_v12, %v6500_v25 }
 0x1f5   : > { %3058 = vst [vmem:[%s6514_s14 + $0x8] sm:$0xff] %v3026_v21  ;;  %v3025_v51 = vsel %vm2954_vm1, %v2922_v17, %v2993_v36  ;;  %v2924_v59 = vadd.f32 %v4981_v31, %v6500_v25  ;;  %v4634_v56 = vpop.f32.mrb[4].mxu0 }
 0x1f6   : > { %3057 = vst [vmem:[%s6514_s14] sm:$0xff] %v3025_v51  ;;  %vm2957_vm2 = vcmp.ge.f32.partialorder %v2925_v15, 0.0  ;;  %v2996_v32 = vmul.f32 %v6507_v45, %v2925_v15  ;;  %v4982_v1 = vadd.f32 %v4634_v56, %v4234_v62  ;;  %v2744_v58 = vpop.f32.mrb[5].mxu0 }
 0x1f7   : > { %vm2956_vm3 = vcmp.ge.f32.partialorder %v2924_v59, 0.0  ;;  %v2995_v47 = vmul.f32 %v6507_v45, %v2924_v59  ;;  %v4983_v22 = vadd.f32 %v2744_v58, %v1213_v3 }
 0x1f8   : > { %v3028_v63 = vsel %vm2957_vm2, %v2925_v15, %v2996_v32  ;;  %v2927_v35 = vadd.f32 %v4982_v1, %v6500_v25 }
 0x1f9   : > { %3060 = vst [vmem:[%s6514_s14 + $0x18] sm:$0xff] %v3028_v63  ;;  %v3027_v30 = vsel %vm2956_vm3, %v2924_v59, %v2995_v47  ;;  %v2926_v60 = vadd.f32 %v4983_v22, %v6500_v25  ;;  %v4637_v26 = vpop.f32.mrb[6].mxu0 }
 0x1fa   : > { %3059 = vst [vmem:[%s6514_s14 + $0x10] sm:$0xff] %v3027_v30  ;;  %vm2959_vm4 = vcmp.ge.f32.partialorder %v2927_v35, 0.0  ;;  %v2998_v27 = vmul.f32 %v6507_v45, %v2927_v35  ;;  %v4984_v33 = vadd.f32 %v4637_v26, %v4237_v57  ;;  %v2754_v43 = vpop.f32.mrb[7].mxu0 }
 0x1fb   : > { %vm2958_vm5 = vcmp.ge.f32.partialorder %v2926_v60, 0.0  ;;  %v2997_v54 = vmul.f32 %v6507_v45, %v2926_v60  ;;  %v4985_v61 = vadd.f32 %v2754_v43, %v1223_v29 }
 0x1fc   : > { %v3030_v4 = vsel %vm2959_vm4, %v2927_v35, %v2998_v27  ;;  %v2929_v10 = vadd.f32 %v4984_v33, %v6500_v25 }
 0x1fd   : > { %3062 = vst [vmem:[%s6514_s14 + $0x28] sm:$0xff] %v3030_v4  ;;  %v3029_v53 = vsel %vm2958_vm5, %v2926_v60, %v2997_v54  ;;  %v2928_v13 = vadd.f32 %v4985_v61, %v6500_v25  ;;  %v4640_v24 = vpop.f32.mrb[8].mxu0 }
 0x1fe   : > { %3061 = vst [vmem:[%s6514_s14 + $0x20] sm:$0xff] %v3029_v53  ;;  %vm2961_vm6 = vcmp.ge.f32.partialorder %v2929_v10, 0.0  ;;  %v3000_v19 = vmul.f32 %v6507_v45, %v2929_v10  ;;  %v4986_v7 = vadd.f32 %v4640_v24, %v6480_v0  ;;  %v2764_v34 = vpop.f32.mrb[9].mxu0 }
 0x1ff   : > { %vm2960_vm7 = vcmp.ge.f32.partialorder %v2928_v13, 0.0  ;;  %v2999_v9 = vmul.f32 %v6507_v45, %v2928_v13  ;;  %v4987_v49 = vadd.f32 %v2764_v34, %v6482_v11 }
 0x200   : > { %v3032_v37 = vsel %vm2961_vm6, %v2929_v10, %v3000_v19  ;;  %v2931_v38 = vadd.f32 %v4986_v7, %v6500_v25 }
 0x201   : > { %3064 = vst [vmem:[%s6514_s14 + $0x38] sm:$0xff] %v3032_v37  ;;  %v3031_v23 = vsel %vm2960_vm7, %v2928_v13, %v2999_v9  ;;  %v2930_v40 = vadd.f32 %v4987_v49, %v6500_v25  ;;  %v4643_v42 = vpop.f32.mrb[10].mxu0 }
 0x202   : > { %3063 = vst [vmem:[%s6514_s14 + $0x30] sm:$0xff] %v3031_v23  ;;  %vm2963_vm8 = vcmp.ge.f32.partialorder %v2931_v38, 0.0  ;;  %v3002_v46 = vmul.f32 %v6507_v45, %v2931_v38  ;;  %v4988_v48 = vadd.f32 %v4643_v42, %v6484_v55  ;;  %v2774_v52 = vpop.f32.mrb[11].mxu0 }
 0x203   : > { %vm2962_vm9 = vcmp.ge.f32.partialorder %v2930_v40, 0.0  ;;  %v3001_v62 = vmul.f32 %v6507_v45, %v2930_v40  ;;  %v4989_v3 = vadd.f32 %v2774_v52, %v6486_v6 }
 0x204   : > { %v3034_v57 = vsel %vm2963_vm8, %v2931_v38, %v3002_v46  ;;  %v2933_v29 = vadd.f32 %v4988_v48, %v6500_v25 }
 0x205   : > { %3066 = vst [vmem:[%s6514_s14 + $0x48] sm:$0xff] %v3034_v57  ;;  %v3033_v0 = vsel %vm2962_vm9, %v2930_v40, %v3001_v62  ;;  %v2932_v11 = vadd.f32 %v4989_v3, %v6500_v25  ;;  %v4646_v14 = vpop.f32.mrb[12].mxu0 }
 0x206   : > { %3065 = vst [vmem:[%s6514_s14 + $0x40] sm:$0xff] %v3033_v0  ;;  %vm2965_vm10 = vcmp.ge.f32.partialorder %v2933_v29, 0.0  ;;  %v3004_v55 = vmul.f32 %v6507_v45, %v2933_v29  ;;  %v4990_v20 = vadd.f32 %v4646_v14, %v6488_v5  ;;  %v2784_v41 = vpop.f32.mrb[13].mxu0 }
 0x207   : > { %vm2964_vm11 = vcmp.ge.f32.partialorder %v2932_v11, 0.0  ;;  %v3003_v6 = vmul.f32 %v6507_v45, %v2932_v11  ;;  %v4991_v44 = vadd.f32 %v2784_v41, %v6490_v16 }
 0x208   : > { %v3036_v28 = vsel %vm2965_vm10, %v2933_v29, %v3004_v55  ;;  %v2935_v17 = vadd.f32 %v4990_v20, %v6500_v25 }
 0x209   : > { %3068 = vst [vmem:[%s6514_s14 + $0x58] sm:$0xff] %v3036_v28  ;;  %v3035_v50 = vsel %vm2964_vm11, %v2932_v11, %v3003_v6  ;;  %v2934_v39 = vadd.f32 %v4991_v44, %v6500_v25  ;;  %v4649_v12 = vpop.f32.mrb[14].mxu0 }
 0x20a   : > { %3067 = vst [vmem:[%s6514_s14 + $0x50] sm:$0xff] %v3035_v50  ;;  %vm2967_vm12 = vcmp.ge.f32.partialorder %v2935_v17, 0.0  ;;  %v3006_v5 = vmul.f32 %v6507_v45, %v2935_v17  ;;  %v4992_v8 = vadd.f32 %v4649_v12, %v6492_v2  ;;  %v2794_v36 = vpop.f32.mrb[15].mxu0 }
 0x20b   : > { %vm2966_vm13 = vcmp.ge.f32.partialorder %v2934_v39, 0.0  ;;  %v3005_v16 = vmul.f32 %v6507_v45, %v2934_v39  ;;  %v4993_v31 = vadd.f32 %v2794_v36, %v6494_v18 }
 0x20c   : > { %v3038_v21 = vsel %vm2967_vm12, %v2935_v17, %v3006_v5  ;;  %v2937_v15 = vadd.f32 %v4992_v8, %v6500_v25  ;;  %v4332_v51 = vpop.f32.mrb[16].mxu1 }
 0x20d   : > { %3070 = vst [vmem:[%s6514_s14 + $0x68] sm:$0xff] %v3038_v21  ;;  %v3037_v59 = vsel %vm2966_vm13, %v2934_v39, %v3005_v16  ;;  %v2936_v56 = vadd.f32 %v4993_v31, %v6500_v25  ;;  %v4652_v32 = vpop.f32.mrb[16].mxu0  ;;  %v1579_v1 = vpop.f32.mrb[17].mxu1 }
 0x20e   : > { %3069 = vst [vmem:[%s6514_s14 + $0x60] sm:$0xff] %v3037_v59  ;;  %vm2969_vm14 = vcmp.ge.f32.partialorder %v2937_v15, 0.0  ;;  %v3008_v2 = vmul.f32 %v6507_v45, %v2937_v15  ;;  %v4994_v58 = vadd.f32 %v4652_v32, %v4332_v51  ;;  %v2804_v47 = vpop.f32.mrb[17].mxu0 }
 0x20f   : > { %vm2968_vm15 = vcmp.ge.f32.partialorder %v2936_v56, 0.0  ;;  %v3007_v18 = vmul.f32 %v6507_v45, %v2936_v56  ;;  %v4995_v22 = vadd.f32 %v2804_v47, %v1579_v1 }
 0x210   : > { %v3040_v63 = vsel %vm2969_vm14, %v2937_v15, %v3008_v2  ;;  %v2939_v35 = vadd.f32 %v4994_v58, %v6500_v25  ;;  %v4335_v30 = vpop.f32.mrb[18].mxu1 }
 0x211   : > { %3072 = vst [vmem:[%s6514_s14 + $0x78] sm:$0xff] %v3040_v63  ;;  %v3039_v60 = vsel %vm2968_vm15, %v2936_v56, %v3007_v18  ;;  %v2938_v26 = vadd.f32 %v4995_v22, %v6500_v25  ;;  %v4655_v27 = vpop.f32.mrb[18].mxu0  ;;  %v1589_v33 = vpop.f32.mrb[19].mxu1 }
 0x212   : > { %3071 = vst [vmem:[%s6514_s14 + $0x70] sm:$0xff] %v3039_v60  ;;  %vm2971_vm0 = vcmp.ge.f32.partialorder %v2939_v35, 0.0  ;;  %v3010_v43 = vmul.f32 %v6507_v45, %v2939_v35  ;;  %v4996_v54 = vadd.f32 %v4655_v27, %v4335_v30  ;;  %v2814_v61 = vpop.f32.mrb[19].mxu0 }
 0x213   : > { %vm2970_vm1 = vcmp.ge.f32.partialorder %v2938_v26, 0.0  ;;  %v3009_v4 = vmul.f32 %v6507_v45, %v2938_v26  ;;  %v4997_v10 = vadd.f32 %v2814_v61, %v1589_v33 }
 0x214   : > { %v3042_v53 = vsel %vm2971_vm0, %v2939_v35, %v3010_v43  ;;  %v2941_v13 = vadd.f32 %v4996_v54, %v6500_v25  ;;  %v4338_v24 = vpop.f32.mrb[20].mxu1 }
 0x215   : > { %3074 = vst [vmem:[%s6514_s14 + $0x88] sm:$0xff] %v3042_v53  ;;  %v3041_v19 = vsel %vm2970_vm1, %v2938_v26, %v3009_v4  ;;  %v2940_v7 = vadd.f32 %v4997_v10, %v6500_v25  ;;  %v4658_v34 = vpop.f32.mrb[20].mxu0  ;;  %v1599_v9 = vpop.f32.mrb[21].mxu1 }
 0x216   : > { %3073 = vst [vmem:[%s6514_s14 + $0x80] sm:$0xff] %v3041_v19  ;;  %vm2973_vm2 = vcmp.ge.f32.partialorder %v2941_v13, 0.0  ;;  %v3012_v49 = vmul.f32 %v6507_v45, %v2941_v13  ;;  %v4998_v37 = vadd.f32 %v4658_v34, %v4338_v24  ;;  %v2824_v38 = vpop.f32.mrb[21].mxu0 }
 0x217   : > { %vm2972_vm3 = vcmp.ge.f32.partialorder %v2940_v7, 0.0  ;;  %v3011_v23 = vmul.f32 %v6507_v45, %v2940_v7  ;;  %v4999_v40 = vadd.f32 %v2824_v38, %v1599_v9 }
 0x218   : > { %v3044_v42 = vsel %vm2973_vm2, %v2941_v13, %v3012_v49  ;;  %v2943_v46 = vadd.f32 %v4998_v37, %v6500_v25  ;;  %v4341_v48 = vpop.f32.mrb[22].mxu1 }
 0x219   : > { %3076 = vst [vmem:[%s6514_s14 + $0x98] sm:$0xff] %v3044_v42  ;;  %v3043_v52 = vsel %vm2972_vm3, %v2940_v7, %v3011_v23  ;;  %v2942_v62 = vadd.f32 %v4999_v40, %v6500_v25  ;;  %v4661_v3 = vpop.f32.mrb[22].mxu0  ;;  %v1609_v57 = vpop.f32.mrb[23].mxu1 }
 0x21a   : > { %3075 = vst [vmem:[%s6514_s14 + $0x90] sm:$0xff] %v3043_v52  ;;  %vm2975_vm4 = vcmp.ge.f32.partialorder %v2943_v46, 0.0  ;;  %v3014_v29 = vmul.f32 %v6507_v45, %v2943_v46  ;;  %v5000_v0 = vadd.f32 %v4661_v3, %v4341_v48  ;;  %v2834_v11 = vpop.f32.mrb[23].mxu0 }
 0x21b   : > { %vm2974_vm5 = vcmp.ge.f32.partialorder %v2942_v62, 0.0  ;;  %v3013_v14 = vmul.f32 %v6507_v45, %v2942_v62  ;;  %v5001_v55 = vadd.f32 %v2834_v11, %v1609_v57 }
 0x21c   : > { %v3046_v20 = vsel %vm2975_vm4, %v2943_v46, %v3014_v29  ;;  %v2945_v41 = vadd.f32 %v5000_v0, %v6500_v25  ;;  %v4344_v6 = vpop.f32.mrb[24].mxu1 }
 0x21d   : > { %3078 = vst [vmem:[%s6514_s14 + $0xa8] sm:$0xff] %v3046_v20  ;;  %v3045_v44 = vsel %vm2974_vm5, %v2942_v62, %v3013_v14  ;;  %v2944_v28 = vadd.f32 %v5001_v55, %v6500_v25  ;;  %v4664_v17 = vpop.f32.mrb[24].mxu0  ;;  %v1619_v50 = vpop.f32.mrb[25].mxu1 }
 0x21e   : > { %3077 = vst [vmem:[%s6514_s14 + $0xa0] sm:$0xff] %v3045_v44  ;;  %vm2977_vm6 = vcmp.ge.f32.partialorder %v2945_v41, 0.0  ;;  %v3016_v39 = vmul.f32 %v6507_v45, %v2945_v41  ;;  %v5002_v12 = vadd.f32 %v4664_v17, %v4344_v6  ;;  %v2844_v5 = vpop.f32.mrb[25].mxu0 }
 0x21f   : > { %vm2976_vm7 = vcmp.ge.f32.partialorder %v2944_v28, 0.0  ;;  %v3015_v8 = vmul.f32 %v6507_v45, %v2944_v28  ;;  %v5003_v36 = vadd.f32 %v2844_v5, %v1619_v50 }
 0x220   : > { %v3048_v16 = vsel %vm2977_vm6, %v2945_v41, %v3016_v39  ;;  %v2947_v31 = vadd.f32 %v5002_v12, %v6500_v25  ;;  %v4347_v21 = vpop.f32.mrb[26].mxu1 }
 0x221   : > { %3080 = vst [vmem:[%s6514_s14 + $0xb8] sm:$0xff] %v3048_v16  ;;  %v3047_v15 = vsel %vm2976_vm7, %v2944_v28, %v3015_v8  ;;  %v2946_v51 = vadd.f32 %v5003_v36, %v6500_v25  ;;  %v4667_v59 = vpop.f32.mrb[26].mxu0  ;;  %v1629_v56 = vpop.f32.mrb[27].mxu1 }
 0x222   : > { %3079 = vst [vmem:[%s6514_s14 + $0xb0] sm:$0xff] %v3047_v15  ;;  %vm2979_vm8 = vcmp.ge.f32.partialorder %v2947_v31, 0.0  ;;  %v3018_v32 = vmul.f32 %v6507_v45, %v2947_v31  ;;  %v5004_v1 = vadd.f32 %v4667_v59, %v4347_v21  ;;  %v2854_v2 = vpop.f32.mrb[27].mxu0 }
 0x223   : > { %vm2978_vm9 = vcmp.ge.f32.partialorder %v2946_v51, 0.0  ;;  %v3017_v58 = vmul.f32 %v6507_v45, %v2946_v51  ;;  %v5005_v47 = vadd.f32 %v2854_v2, %v1629_v56 }
 0x224   : > { %v3050_v18 = vsel %vm2979_vm8, %v2947_v31, %v3018_v32  ;;  %v2949_v22 = vadd.f32 %v5004_v1, %v6500_v25  ;;  %v4350_v63 = vpop.f32.mrb[28].mxu1 }
 0x225   : > { %3082 = vst [vmem:[%s6514_s14 + $0xc8] sm:$0xff] %v3050_v18  ;;  %v3049_v35 = vsel %vm2978_vm9, %v2946_v51, %v3017_v58  ;;  %v2948_v30 = vadd.f32 %v5005_v47, %v6500_v25  ;;  %v4670_v60 = vpop.f32.mrb[28].mxu0  ;;  %v1639_v26 = vpop.f32.mrb[29].mxu1 }
 0x226   : > { %3081 = vst [vmem:[%s6514_s14 + $0xc0] sm:$0xff] %v3049_v35  ;;  %vm2981_vm10 = vcmp.ge.f32.partialorder %v2949_v22, 0.0  ;;  %v3020_v27 = vmul.f32 %v6507_v45, %v2949_v22  ;;  %v5006_v33 = vadd.f32 %v4670_v60, %v4350_v63  ;;  %v2864_v43 = vpop.f32.mrb[29].mxu0 }
 0x227   : > { %vm2980_vm11 = vcmp.ge.f32.partialorder %v2948_v30, 0.0  ;;  %v3019_v54 = vmul.f32 %v6507_v45, %v2948_v30  ;;  %v5007_v61 = vadd.f32 %v2864_v43, %v1639_v26 }
 0x228   : > { %v3052_v4 = vsel %vm2981_vm10, %v2949_v22, %v3020_v27  ;;  %v2951_v10 = vadd.f32 %v5006_v33, %v6500_v25  ;;  %v4353_v53 = vpop.f32.mrb[30].mxu1 }
 0x229   : > { %3084 = vst [vmem:[%s6514_s14 + $0xd8] sm:$0xff] %v3052_v4  ;;  %v3051_v13 = vsel %vm2980_vm11, %v2948_v30, %v3019_v54  ;;  %v2950_v24 = vadd.f32 %v5007_v61, %v6500_v25  ;;  %v4673_v19 = vpop.f32.mrb[30].mxu0  ;;  %v1649_v7 = vpop.f32.mrb[31].mxu1 }
 0x22a   : > { %3083 = vst [vmem:[%s6514_s14 + $0xd0] sm:$0xff] %v3051_v13  ;;  %vm2983_vm12 = vcmp.ge.f32.partialorder %v2951_v10, 0.0  ;;  %v3022_v34 = vmul.f32 %v6507_v45, %v2951_v10  ;;  %v5008_v9 = vadd.f32 %v4673_v19, %v4353_v53  ;;  %v2874_v49 = vpop.f32.mrb[31].mxu0 }
 0x22b   : > { %vm2982_vm13 = vcmp.ge.f32.partialorder %v2950_v24, 0.0  ;;  %v3021_v37 = vmul.f32 %v6507_v45, %v2950_v24  ;;  %v5009_v38 = vadd.f32 %v2874_v49, %v1649_v7 }
 0x22c   : > { %v3054_v23 = vsel %vm2983_vm12, %v2951_v10, %v3022_v34  ;;  %v2953_v40 = vadd.f32 %v5008_v9, %v6500_v25 }
 0x22d   : > { %3086 = vst [vmem:[%s6514_s14 + $0xe8] sm:$0xff] %v3054_v23  ;;  %v3053_v42 = vsel %vm2982_vm13, %v2950_v24, %v3021_v37  ;;  %v2952_v46 = vadd.f32 %v5009_v38, %v6500_v25 }
 0x22e   : > { %3085 = vst [vmem:[%s6514_s14 + $0xe0] sm:$0xff] %v3053_v42  ;;  %vm2985_vm14 = vcmp.ge.f32.partialorder %v2953_v40, 0.0  ;;  %v3024_v48 = vmul.f32 %v6507_v45, %v2953_v40 }
 0x22f   : > { %vm2984_vm15 = vcmp.ge.f32.partialorder %v2952_v46, 0.0  ;;  %v3023_v52 = vmul.f32 %v6507_v45, %v2952_v46 }
 0x230   : > { %v3056_v62 = vsel %vm2985_vm14, %v2953_v40, %v3024_v48 }
 0x231   : > { %3088 = vst [vmem:[%s6514_s14 + $0xf8] sm:$0xff] %v3056_v62  ;;  %v3055_v25 = vsel %vm2984_vm15, %v2952_v46, %v3023_v52 }
 0x232   : > { %3087 = vst [vmem:[%s6514_s14 + $0xf0] sm:$0xff] %v3055_v25 }
 0x233   : > { %5305 = shalt.err (!%p5302_p5)
}
 0x234   : > { %s5306_s7 = scalar_lea.hbm %s6618_s29, 4096  ;;  %s5310_s11 = scalar_lea.hbm %s6676_s4, 8192 }
 0x235   : > { %p5307_p6 = scmp.ne.s32.totalorder %s6618_s29, %s5306_s7  ;;  %p5311_p10 = scmp.lt.u32.totalorder %s6618_s29, %s6676_s4 }
 0x236   : > { %p5312_p11 = scmp.lt.u32.totalorder %s5310_s11, %s5306_s7  ;;  %p5314_p13 = scmp.lt.u32.totalorder %s5306_s7, %s6618_s29 }
 0x237   : > { %p5308_p7 = pnand %p5307_p6, %p5440_p4 }
 0x238   : > { %p5313_p12 = por %p5312_p11, %p5311_p10 }
 0x239   : > { %p5309_p9 = pneg %p5308_p7 }
 0x23a   : > { %p5315_p0 = por %p5314_p13, %p5313_p12 }
 0x23c   : > { %p5316_p1 = pnand %p5315_p0, %p5309_p9 }
 0x23e   : > { %5319 = shalt.err (!%p5316_p1)
}
 0x23f   : > { %s5373_s14 = smov 128   ;;  %s5374_s21 = smov 8  }
 0x240   : > { %5235 = dma.vmem_to_hbm [thread:$0]  (%p5440_p4), %s6620_s22, 4096, %s6618_s29, %s6626_s18, %s5373_s14, %s5373_s14, %s5374_s21  }
 0x241 PF: > { %p5241_p2 = scmp.ge.s32.totalorder %s5370_s20, 2  ;;  %s3120_s24 = sand.u32 1, %s5350_s15  }
 0x242   : > { %s3121_s26 = scalar_lea.sflag [#allocation3], %s3120_s24 }
 0x243   : > { %p5238_p3 = pnand %p5241_p2, %p5447_p8 }
 0x245   : > { %5345 = dma.done.wait (!%p5238_p3), %s3121_s26, 4096  }
 0x246   : > { %5347 = vsyncadd (!%p5238_p3), %s3121_s26, 4294963200  ;;  %s17_s20 = sadd.s32 1, %s5370_s20   ;;  %s6779_s15 = smov %s5354_s16 }
 0x247   : > { %p14_p5 = scmp.ge.s32.totalorder %s17_s20, 4   ;;  %s6780_s16 = smov %s5358_s17 }
 0x248   : > { %s6781_s17 = smov %s5453_s28  ;;  %s6782_s18 = smov %s5366_s19 }
 0x249   : > { %s6783_s19 = smov %s6785_s23  ;;  %16 = sbr.rel (!%p14_p5) target bundleno = 4 (0x4), region = 81 }
 0x250   :  { %3126 = vsyncpa [#allocation3], 1 }
 0x251   :  { %3128 = vsyncpa [#allocation3 + $0x1], 1 }

</bundles_post_ra>
